<compile_context>
chip_gen: v6e
topology: v6e:2x2x1
jax: 0.10.0
libtpu: 0.0.40
codegen_flags: <defaults>
</compile_context>

<pallas_src>
import math
import functools

import jax
import jax.numpy as jnp
from jax.experimental import pallas as pl
from jax.experimental.pallas import tpu as pltpu

# ---------------- configuration (small synthetic BERT) ----------------
VOCAB = 100
MAX_POS = 64
HIDDEN = 32
NUM_HEADS = 2
HEAD_DIM = HIDDEN // NUM_HEADS
INTERMEDIATE = 64
NUM_LAYERS = 2
NUM_CLASS = 3
LN_EPS = 1e-12  # BERT LayerNorm eps
ATT_SCALE = 1.0 / math.sqrt(HEAD_DIM)

# row indices inside the packed per-layer "smalls" array (L, 8, 128)
_R_BQKV, _R_BO, _R_G1, _R_B1LN, _R_BFF1, _R_BFF2, _R_G2, _R_B2LN = range(8)
# row indices inside the packed global "glob" array (4, 128)
_G_EMB_G, _G_EMB_B, _G_POOL_B, _G_CLS_B = range(4)


# ---------------- in-kernel helpers ----------------
def _layernorm(x, g, b):
    mu = jnp.mean(x, axis=-1, keepdims=True)
    d = x - mu
    var = jnp.mean(d * d, axis=-1, keepdims=True)
    return d * jax.lax.rsqrt(var + LN_EPS) * g + b


def _gelu(x):
    # tanh-approx GELU (TODO(synk): HF BERT default is exact erf GELU).
    return 0.5 * x * (1.0 + jnp.tanh(0.7978845608028654 * (x + 0.044715 * x * x * x)))


# ---------------- fully-fused BERT forward kernel ----------------
def _bert_forward_kernel(
    x_ref, mask_ref,
    wqkv_ref, wo_ref, w1_ref, w2_ref, smalls_ref, glob_ref, pw_ref, cw_ref,
    o_ref, *, batch, seq, num_layers):
    f32 = jnp.float32
    H, Dh, NH, I = HIDDEN, HEAD_DIM, NUM_HEADS, INTERMEDIATE

    glob = glob_ref[...]                                           # (4, 128)

    # --- embedding LayerNorm ---
    x = _layernorm(x_ref[...], glob[_G_EMB_G:_G_EMB_G + 1, :H],
                   glob[_G_EMB_B:_G_EMB_B + 1, :H])                # (B*S, H)

    mask_bias = mask_ref[...]                                      # (B, 1, S) additive

    # --- encoder layers (statically unrolled; NUM_LAYERS=2 is tiny) ---
    for l in range(num_layers):
        wqkv = wqkv_ref[l]                                         # (H, 3H)
        wo = wo_ref[l]                                             # (H, H)
        w1 = w1_ref[l]                                             # (H, I)
        w2 = w2_ref[l]                                             # (I, H)
        sm = smalls_ref[l]                                         # (8, 128) packed biases
        bqkv = sm[_R_BQKV:_R_BQKV + 1, :3 * H]
        bo = sm[_R_BO:_R_BO + 1, :H]
        g1 = sm[_R_G1:_R_G1 + 1, :H]
        be1 = sm[_R_B1LN:_R_B1LN + 1, :H]
        b1 = sm[_R_BFF1:_R_BFF1 + 1, :I]
        b2 = sm[_R_BFF2:_R_BFF2 + 1, :H]
        g2 = sm[_R_G2:_R_G2 + 1, :H]
        be2 = sm[_R_B2LN:_R_B2LN + 1, :H]

        # fused QKV projection (lane-dense N = 3*HIDDEN)
        qkv = jnp.dot(x, wqkv, preferred_element_type=f32) + bqkv  # (B*S, 3H)

        # multi-head attention: batched-over-B dots per head, output projection
        # accumulated per head (K-split of wo) — no row concatenates, no per-b loop.
        attn = None
        for h in range(NH):
            q = qkv[:, h * Dh:(h + 1) * Dh].reshape(batch, seq, Dh)
            k = qkv[:, H + h * Dh:H + (h + 1) * Dh].reshape(batch, seq, Dh)
            v = qkv[:, 2 * H + h * Dh:2 * H + (h + 1) * Dh].reshape(batch, seq, Dh)
            s = jnp.einsum('bqd,bkd->bqk', q, k,
                           preferred_element_type=f32) * ATT_SCALE + mask_bias  # (B,S,S)
            s = s - jnp.max(s, axis=-1, keepdims=True)
            p = jnp.exp(s)
            p = p / jnp.sum(p, axis=-1, keepdims=True)             # exact softmax
            ctx = jnp.einsum('bqk,bkd->bqd', p, v,
                             preferred_element_type=f32)           # (B, S, Dh)
            contrib = jnp.dot(ctx.reshape(batch * seq, Dh),
                              wo[h * Dh:(h + 1) * Dh, :],
                              preferred_element_type=f32)          # (B*S, H)
            attn = contrib if attn is None else attn + contrib
        attn = attn + bo

        # residual + LayerNorm 1
        h1 = _layernorm(attn + x, g1, be1)

        # feed-forward
        ff = jnp.dot(h1, w1, preferred_element_type=f32) + b1
        ff = _gelu(ff)
        ff = jnp.dot(ff, w2, preferred_element_type=f32) + b2

        # residual + LayerNorm 2
        x = _layernorm(ff + h1, g2, be2)

    # --- pooler (CLS token) + classifier ---
    # Select CLS rows (row b*seq for each batch b) with a one-hot matmul: stays on the
    # MXU and avoids mid-tile squeezes / strided sublane gathers.
    rows = jax.lax.broadcasted_iota(jnp.int32, (batch, batch * seq), 0)
    cols = jax.lax.broadcasted_iota(jnp.int32, (batch, batch * seq), 1)
    sel = (cols == rows * seq).astype(f32)                         # (B, B*S)
    cls_tok = jnp.dot(sel, x, preferred_element_type=f32)          # (B, H)

    pooled = jnp.tanh(jnp.dot(cls_tok, pw_ref[...], preferred_element_type=f32)
                      + glob[_G_POOL_B:_G_POOL_B + 1, :H])
    o_ref[...] = (jnp.dot(pooled, cw_ref[...], preferred_element_type=f32)
                  + glob[_G_CLS_B:_G_CLS_B + 1, :NUM_CLASS])


def pallas_bert_forward(x, addmask, params):
    BS, _ = x.shape
    B, _, S = addmask.shape

    args = [
        x, addmask,
        params["wqkv"], params["wo"], params["w1"], params["w2"],
        params["smalls"], params["glob"], params["pooler_w"], params["cls_w"],
    ]

    def fs(shape):
        n = len(shape)
        return pl.BlockSpec(shape, lambda i, _n=n: (0,) * _n)

    return pl.pallas_call(
        functools.partial(_bert_forward_kernel, batch=B, seq=S, num_layers=NUM_LAYERS),
        out_shape=jax.ShapeDtypeStruct((B, NUM_CLASS), jnp.float32),
        grid=(1,),
        in_specs=[fs(a.shape) for a in args],
        out_specs=fs((B, NUM_CLASS)),
        compiler_params=pltpu.CompilerParams(dimension_semantics=("arbitrary",)),
    )(*args)


# ---------------- parameters (deterministic synthetic init, packed layout) ----------------
def _pad_row(v, width=128):
    v = jnp.asarray(v, jnp.float32).reshape(-1)
    return jnp.pad(v, (0, width - v.shape[0]))


def init_params(key):
    def nrm(k, shape):
        return (jax.random.normal(k, shape, jnp.float32) * 0.02).astype(jnp.float32)

    keys = jax.random.split(key, 5 + NUM_LAYERS)
    params = {
        "word_emb": nrm(keys[0], (VOCAB, HIDDEN)),
        "pos_emb": nrm(keys[1], (MAX_POS, HIDDEN)),
        "tok_emb": nrm(keys[2], (2, HIDDEN)),
        "pooler_w": nrm(keys[3], (HIDDEN, HIDDEN)),
        "cls_w": nrm(keys[4], (HIDDEN, NUM_CLASS)),
    }

    wqkv_l, wo_l, w1_l, w2_l, smalls_l = [], [], [], [], []
    for l in range(NUM_LAYERS):
        lk = jax.random.split(keys[5 + l], 6)
        wq = nrm(lk[0], (HIDDEN, HIDDEN))
        wk = nrm(lk[1], (HIDDEN, HIDDEN))
        wv = nrm(lk[2], (HIDDEN, HIDDEN))
        wqkv_l.append(jnp.concatenate([wq, wk, wv], axis=1))       # fused QKV weight
        wo_l.append(nrm(lk[3], (HIDDEN, HIDDEN)))
        w1_l.append(nrm(lk[4], (HIDDEN, INTERMEDIATE)))
        w2_l.append(nrm(lk[5], (INTERMEDIATE, HIDDEN)))
        # packed per-layer small params: [bqkv, bo, ln1_g, ln1_b, b1, b2, ln2_g, ln2_b]
        smalls_l.append(jnp.stack([
            _pad_row(jnp.zeros((3 * HIDDEN,))),     # bqkv
            _pad_row(jnp.zeros((HIDDEN,))),         # bo
            _pad_row(jnp.ones((HIDDEN,))),          # ln1 gamma
            _pad_row(jnp.zeros((HIDDEN,))),         # ln1 beta
            _pad_row(jnp.zeros((INTERMEDIATE,))),   # ffn b1
            _pad_row(jnp.zeros((HIDDEN,))),         # ffn b2
            _pad_row(jnp.ones((HIDDEN,))),          # ln2 gamma
            _pad_row(jnp.zeros((HIDDEN,))),         # ln2 beta
        ]))

    params["wqkv"] = jnp.stack(wqkv_l)       # (L, H, 3H)
    params["wo"] = jnp.stack(wo_l)           # (L, H, H)
    params["w1"] = jnp.stack(w1_l)           # (L, H, I)
    params["w2"] = jnp.stack(w2_l)           # (L, I, H)
    params["smalls"] = jnp.stack(smalls_l)   # (L, 8, 128)
    # packed globals: [emb_ln_g, emb_ln_b, pooler_b, cls_b]
    params["glob"] = jnp.stack([
        _pad_row(jnp.ones((HIDDEN,))),
        _pad_row(jnp.zeros((HIDDEN,))),
        _pad_row(jnp.zeros((HIDDEN,))),
        _pad_row(jnp.zeros((NUM_CLASS,))),
    ])                                       # (4, 128)
    return params


# ---------------- model forward (mirrors BertClassifier.forward) ----------------
def bert_classifier_forward(params, batch):
    input_ids = jnp.asarray(batch["input_ids"], jnp.int32)
    attention_mask = jnp.asarray(batch["attention_mask"], jnp.int32)
    labels = jnp.asarray(batch["label"], jnp.int32)
    B, S = input_ids.shape

    # --- embeddings: word + position + token_type(=0) (plain-JAX gathers) ---
    x = (
        params["word_emb"][input_ids]
        + params["pos_emb"][:S][None, :, :]
        + params["tok_emb"][0][None, None, :]
    )
    x = x.reshape(B * S, HIDDEN).astype(jnp.float32)

    # additive attention mask, pre-shaped (B, 1, S) for broadcast against (B, S, S) scores
    addmask = ((1.0 - attention_mask.astype(jnp.float32)) * -1e9)[:, None, :]

    # --- single fused Pallas kernel: emb LN + all layers + pooler + classifier ---
    logits = pallas_bert_forward(x, addmask, params)

    # (dropout before classifier is identity at inference)
    return logits, labels, None


# ---------------- main ----------------
if __name__ == "__main__":
    key = jax.random.PRNGKey(0)
    pkey, dkey1, dkey2 = jax.random.split(key, 3)
    params = init_params(pkey)

    B, S = 2, 8
    input_ids = jax.random.randint(dkey1, (B, S), 0, VOCAB, dtype=jnp.int32)
    attention_mask = jnp.array(
        [[1, 1, 1, 1, 1, 1, 0, 0], [1, 1, 1, 1, 1, 1, 1, 1]], dtype=jnp.int32
    )
    labels = jax.random.randint(dkey2, (B,), 0, NUM_CLASS, dtype=jnp.int32)
    batch = {"input_ids": input_ids, "attention_mask": attention_mask, "label": labels}

    logits, labs, extra = bert_classifier_forward(params, batch)
    jax.block_until_ready(logits)

    assert logits.shape == (B, NUM_CLASS)
    assert labs.shape == (B,)
    assert extra is None
    print("KERNEL_OK")
</pallas_src>

<mosaic_0001>
module attributes {stable_mosaic.version = 11 : i64} {
  func.func @_bert_forward_kernel(%arg0: i32, %arg1: memref<16x32xf32, #tpu.memory_space<vmem>>, %arg2: memref<2x1x8xf32, #tpu.memory_space<vmem>>, %arg3: memref<2x32x96xf32, #tpu.memory_space<vmem>>, %arg4: memref<2x32x32xf32, #tpu.memory_space<vmem>>, %arg5: memref<2x32x64xf32, #tpu.memory_space<vmem>>, %arg6: memref<2x64x32xf32, #tpu.memory_space<vmem>>, %arg7: memref<2x8x128xf32, #tpu.memory_space<vmem>>, %arg8: memref<4x128xf32, #tpu.memory_space<vmem>>, %arg9: memref<32x32xf32, #tpu.memory_space<vmem>>, %arg10: memref<32x3xf32, #tpu.memory_space<vmem>>, %arg11: memref<2x3xf32, #tpu.memory_space<vmem>>) attributes {dimension_semantics = [#tpu.dimension_semantics<arbitrary>], iteration_bounds = array<i64: 1>, scalar_prefetch = 0 : i64, scratch_operands = 0 : i64, tpu.core_type = #tpu.core_type<tc>, window_params = [{pipeline_mode = #tpu.pipeline_mode<synchronous>, transform_indices = @transform_0, window_bounds = array<i64: 16, 32>}, {pipeline_mode = #tpu.pipeline_mode<synchronous>, transform_indices = @transform_1, window_bounds = array<i64: 2, 1, 8>}, {pipeline_mode = #tpu.pipeline_mode<synchronous>, transform_indices = @transform_2, window_bounds = array<i64: 2, 32, 96>}, {pipeline_mode = #tpu.pipeline_mode<synchronous>, transform_indices = @transform_3, window_bounds = array<i64: 2, 32, 32>}, {pipeline_mode = #tpu.pipeline_mode<synchronous>, transform_indices = @transform_4, window_bounds = array<i64: 2, 32, 64>}, {pipeline_mode = #tpu.pipeline_mode<synchronous>, transform_indices = @transform_5, window_bounds = array<i64: 2, 64, 32>}, {pipeline_mode = #tpu.pipeline_mode<synchronous>, transform_indices = @transform_6, window_bounds = array<i64: 2, 8, 128>}, {pipeline_mode = #tpu.pipeline_mode<synchronous>, transform_indices = @transform_7, window_bounds = array<i64: 4, 128>}, {pipeline_mode = #tpu.pipeline_mode<synchronous>, transform_indices = @transform_8, window_bounds = array<i64: 32, 32>}, {pipeline_mode = #tpu.pipeline_mode<synchronous>, transform_indices = @transform_9, window_bounds = array<i64: 32, 3>}, {pipeline_mode = #tpu.pipeline_mode<synchronous>, transform_indices = @transform_10, window_bounds = array<i64: 2, 3>}]} {
    %c0 = arith.constant 0 : index
    %c0_0 = arith.constant 0 : index
    %0 = vector.load %arg8[%c0, %c0_0] : memref<4x128xf32, #tpu.memory_space<vmem>>, vector<4x128xf32>
    %c0_1 = arith.constant 0 : index
    %c0_2 = arith.constant 0 : index
    %1 = vector.load %arg1[%c0_1, %c0_2] : memref<16x32xf32, #tpu.memory_space<vmem>>, vector<16x32xf32>
    %2 = vector.extract_strided_slice %0 {offsets = [0, 0], sizes = [1, 32], strides = [1, 1]} : vector<4x128xf32> to vector<1x32xf32>
    %3 = vector.extract_strided_slice %0 {offsets = [1, 0], sizes = [1, 32], strides = [1, 1]} : vector<4x128xf32> to vector<1x32xf32>
    %cst = arith.constant dense<0.000000e+00> : vector<16xf32>
    %4 = vector.multi_reduction <add>, %1, %cst [1] : vector<16x32xf32> to vector<16xf32>
    %5 = vector.shape_cast %4 : vector<16xf32> to vector<16x1xf32>
    %cst_3 = arith.constant 3.200000e+01 : f32
    %6 = vector.broadcast %cst_3 : f32 to vector<16x1xf32>
    %7 = arith.divf %5, %6 : vector<16x1xf32>
    %8 = vector.broadcast %7 : vector<16x1xf32> to vector<16x32xf32>
    %9 = arith.subf %1, %8 : vector<16x32xf32>
    %10 = arith.mulf %9, %9 : vector<16x32xf32>
    %cst_4 = arith.constant dense<0.000000e+00> : vector<16xf32>
    %11 = vector.multi_reduction <add>, %10, %cst_4 [1] : vector<16x32xf32> to vector<16xf32>
    %12 = vector.shape_cast %11 : vector<16xf32> to vector<16x1xf32>
    %cst_5 = arith.constant 3.200000e+01 : f32
    %13 = vector.broadcast %cst_5 : f32 to vector<16x1xf32>
    %14 = arith.divf %12, %13 : vector<16x1xf32>
    %cst_6 = arith.constant 9.99999996E-13 : f32
    %15 = vector.broadcast %cst_6 : f32 to vector<16x1xf32>
    %16 = arith.addf %14, %15 : vector<16x1xf32>
    %17 = math.rsqrt %16 : vector<16x1xf32>
    %18 = vector.broadcast %17 : vector<16x1xf32> to vector<16x32xf32>
    %19 = arith.mulf %9, %18 : vector<16x32xf32>
    %20 = vector.broadcast %2 : vector<1x32xf32> to vector<16x32xf32>
    %21 = arith.mulf %19, %20 : vector<16x32xf32>
    %22 = vector.broadcast %3 : vector<1x32xf32> to vector<16x32xf32>
    %23 = arith.addf %21, %22 : vector<16x32xf32>
    %c0_7 = arith.constant 0 : index
    %c0_8 = arith.constant 0 : index
    %c0_9 = arith.constant 0 : index
    %24 = vector.load %arg2[%c0_7, %c0_8, %c0_9] : memref<2x1x8xf32, #tpu.memory_space<vmem>>, vector<2x1x8xf32>
    %c0_10 = arith.constant 0 : index
    %c0_11 = arith.constant 0 : index
    %c0_12 = arith.constant 0 : index
    %25 = vector.load %arg3[%c0_10, %c0_11, %c0_12] : memref<2x32x96xf32, #tpu.memory_space<vmem>>, vector<1x32x96xf32>
    %26 = vector.shape_cast %25 : vector<1x32x96xf32> to vector<32x96xf32>
    %c0_13 = arith.constant 0 : index
    %c0_14 = arith.constant 0 : index
    %c0_15 = arith.constant 0 : index
    %27 = vector.load %arg4[%c0_13, %c0_14, %c0_15] : memref<2x32x32xf32, #tpu.memory_space<vmem>>, vector<1x32x32xf32>
    %28 = vector.shape_cast %27 : vector<1x32x32xf32> to vector<32x32xf32>
    %c0_16 = arith.constant 0 : index
    %c0_17 = arith.constant 0 : index
    %c0_18 = arith.constant 0 : index
    %29 = vector.load %arg5[%c0_16, %c0_17, %c0_18] : memref<2x32x64xf32, #tpu.memory_space<vmem>>, vector<1x32x64xf32>
    %30 = vector.shape_cast %29 : vector<1x32x64xf32> to vector<32x64xf32>
    %c0_19 = arith.constant 0 : index
    %c0_20 = arith.constant 0 : index
    %c0_21 = arith.constant 0 : index
    %31 = vector.load %arg6[%c0_19, %c0_20, %c0_21] : memref<2x64x32xf32, #tpu.memory_space<vmem>>, vector<1x64x32xf32>
    %32 = vector.shape_cast %31 : vector<1x64x32xf32> to vector<64x32xf32>
    %c0_22 = arith.constant 0 : index
    %c0_23 = arith.constant 0 : index
    %c0_24 = arith.constant 0 : index
    %33 = vector.load %arg7[%c0_22, %c0_23, %c0_24] : memref<2x8x128xf32, #tpu.memory_space<vmem>>, vector<1x8x128xf32>
    %34 = vector.shape_cast %33 : vector<1x8x128xf32> to vector<8x128xf32>
    %35 = vector.extract_strided_slice %34 {offsets = [0, 0], sizes = [1, 96], strides = [1, 1]} : vector<8x128xf32> to vector<1x96xf32>
    %36 = vector.extract_strided_slice %34 {offsets = [1, 0], sizes = [1, 32], strides = [1, 1]} : vector<8x128xf32> to vector<1x32xf32>
    %37 = vector.extract_strided_slice %34 {offsets = [2, 0], sizes = [1, 32], strides = [1, 1]} : vector<8x128xf32> to vector<1x32xf32>
    %38 = vector.extract_strided_slice %34 {offsets = [3, 0], sizes = [1, 32], strides = [1, 1]} : vector<8x128xf32> to vector<1x32xf32>
    %39 = vector.extract_strided_slice %34 {offsets = [4, 0], sizes = [1, 64], strides = [1, 1]} : vector<8x128xf32> to vector<1x64xf32>
    %40 = vector.extract_strided_slice %34 {offsets = [5, 0], sizes = [1, 32], strides = [1, 1]} : vector<8x128xf32> to vector<1x32xf32>
    %41 = vector.extract_strided_slice %34 {offsets = [6, 0], sizes = [1, 32], strides = [1, 1]} : vector<8x128xf32> to vector<1x32xf32>
    %42 = vector.extract_strided_slice %34 {offsets = [7, 0], sizes = [1, 32], strides = [1, 1]} : vector<8x128xf32> to vector<1x32xf32>
    %cst_25 = arith.constant dense<0.000000e+00> : vector<16x96xf32>
    %43 = tpu.matmul %23, %26, %cst_25 {dimension_numbers = #tpu.dot_dimension_numbers<[1], [0], [0], [1], [0, 0, 1, 1], [], []>} : vector<16x32xf32>, vector<32x96xf32>, vector<16x96xf32> -> vector<16x96xf32>
    %44 = vector.broadcast %35 : vector<1x96xf32> to vector<16x96xf32>
    %45 = arith.addf %43, %44 : vector<16x96xf32>
    %46 = vector.extract_strided_slice %45 {offsets = [0, 0], sizes = [16, 16], strides = [1, 1]} : vector<16x96xf32> to vector<16x16xf32>
    %47 = vector.shape_cast %46 : vector<16x16xf32> to vector<2x8x16xf32>
    %48 = vector.extract_strided_slice %45 {offsets = [0, 32], sizes = [16, 16], strides = [1, 1]} : vector<16x96xf32> to vector<16x16xf32>
    %49 = vector.shape_cast %48 : vector<16x16xf32> to vector<2x8x16xf32>
    %50 = vector.extract_strided_slice %45 {offsets = [0, 64], sizes = [16, 16], strides = [1, 1]} : vector<16x96xf32> to vector<16x16xf32>
    %51 = vector.shape_cast %50 : vector<16x16xf32> to vector<2x8x16xf32>
    "tpu.trace_start"() <{level = 10 : i32, message = "bqd,bkd->bqk"}> : () -> ()
    %cst_26 = arith.constant dense<0.000000e+00> : vector<2x8x8xf32>
    %52 = tpu.matmul %47, %49, %cst_26 {dimension_numbers = #tpu.dot_dimension_numbers<[2], [2], [1], [1], [0, 0, 0, 1, 1, 1], [0], [0]>} : vector<2x8x16xf32>, vector<2x8x16xf32>, vector<2x8x8xf32> -> vector<2x8x8xf32>
    "tpu.trace_stop"() : () -> ()
    %cst_27 = arith.constant 2.500000e-01 : f32
    %53 = vector.broadcast %cst_27 : f32 to vector<2x8x8xf32>
    %54 = arith.mulf %52, %53 : vector<2x8x8xf32>
    %55 = vector.broadcast %24 : vector<2x1x8xf32> to vector<2x8x8xf32>
    %56 = arith.addf %54, %55 : vector<2x8x8xf32>
    %cst_28 = arith.constant dense<0xFF800000> : vector<2x8xf32>
    %57 = vector.multi_reduction <maximumf>, %56, %cst_28 [2] : vector<2x8x8xf32> to vector<2x8xf32>
    %58 = vector.shape_cast %57 : vector<2x8xf32> to vector<2x8x1xf32>
    %59 = vector.broadcast %58 : vector<2x8x1xf32> to vector<2x8x8xf32>
    %60 = arith.subf %56, %59 : vector<2x8x8xf32>
    %61 = math.exp %60 : vector<2x8x8xf32>
    %cst_29 = arith.constant dense<0.000000e+00> : vector<2x8xf32>
    %62 = vector.multi_reduction <add>, %61, %cst_29 [2] : vector<2x8x8xf32> to vector<2x8xf32>
    %63 = vector.shape_cast %62 : vector<2x8xf32> to vector<2x8x1xf32>
    %64 = vector.broadcast %63 : vector<2x8x1xf32> to vector<2x8x8xf32>
    %65 = arith.divf %61, %64 : vector<2x8x8xf32>
    "tpu.trace_start"() <{level = 10 : i32, message = "bqk,bkd->bqd"}> : () -> ()
    %cst_30 = arith.constant dense<0.000000e+00> : vector<2x8x16xf32>
    %66 = tpu.matmul %65, %51, %cst_30 {dimension_numbers = #tpu.dot_dimension_numbers<[2], [1], [1], [2], [0, 0, 0, 1, 1, 2], [0], [0]>} : vector<2x8x8xf32>, vector<2x8x16xf32>, vector<2x8x16xf32> -> vector<2x8x16xf32>
    "tpu.trace_stop"() : () -> ()
    %67 = vector.shape_cast %66 : vector<2x8x16xf32> to vector<16x16xf32>
    %68 = vector.extract_strided_slice %28 {offsets = [0, 0], sizes = [16, 32], strides = [1, 1]} : vector<32x32xf32> to vector<16x32xf32>
    %cst_31 = arith.constant dense<0.000000e+00> : vector<16x32xf32>
    %69 = tpu.matmul %67, %68, %cst_31 {dimension_numbers = #tpu.dot_dimension_numbers<[1], [0], [0], [1], [0, 0, 1, 1], [], []>} : vector<16x16xf32>, vector<16x32xf32>, vector<16x32xf32> -> vector<16x32xf32>
    %70 = vector.extract_strided_slice %45 {offsets = [0, 16], sizes = [16, 16], strides = [1, 1]} : vector<16x96xf32> to vector<16x16xf32>
    %71 = vector.shape_cast %70 : vector<16x16xf32> to vector<2x8x16xf32>
    %72 = vector.extract_strided_slice %45 {offsets = [0, 48], sizes = [16, 16], strides = [1, 1]} : vector<16x96xf32> to vector<16x16xf32>
    %73 = vector.shape_cast %72 : vector<16x16xf32> to vector<2x8x16xf32>
    %74 = vector.extract_strided_slice %45 {offsets = [0, 80], sizes = [16, 16], strides = [1, 1]} : vector<16x96xf32> to vector<16x16xf32>
    %75 = vector.shape_cast %74 : vector<16x16xf32> to vector<2x8x16xf32>
    "tpu.trace_start"() <{level = 10 : i32, message = "bqd,bkd->bqk"}> : () -> ()
    %cst_32 = arith.constant dense<0.000000e+00> : vector<2x8x8xf32>
    %76 = tpu.matmul %71, %73, %cst_32 {dimension_numbers = #tpu.dot_dimension_numbers<[2], [2], [1], [1], [0, 0, 0, 1, 1, 1], [0], [0]>} : vector<2x8x16xf32>, vector<2x8x16xf32>, vector<2x8x8xf32> -> vector<2x8x8xf32>
    "tpu.trace_stop"() : () -> ()
    %cst_33 = arith.constant 2.500000e-01 : f32
    %77 = vector.broadcast %cst_33 : f32 to vector<2x8x8xf32>
    %78 = arith.mulf %76, %77 : vector<2x8x8xf32>
    %79 = vector.broadcast %24 : vector<2x1x8xf32> to vector<2x8x8xf32>
    %80 = arith.addf %78, %79 : vector<2x8x8xf32>
    %cst_34 = arith.constant dense<0xFF800000> : vector<2x8xf32>
    %81 = vector.multi_reduction <maximumf>, %80, %cst_34 [2] : vector<2x8x8xf32> to vector<2x8xf32>
    %82 = vector.shape_cast %81 : vector<2x8xf32> to vector<2x8x1xf32>
    %83 = vector.broadcast %82 : vector<2x8x1xf32> to vector<2x8x8xf32>
    %84 = arith.subf %80, %83 : vector<2x8x8xf32>
    %85 = math.exp %84 : vector<2x8x8xf32>
    %cst_35 = arith.constant dense<0.000000e+00> : vector<2x8xf32>
    %86 = vector.multi_reduction <add>, %85, %cst_35 [2] : vector<2x8x8xf32> to vector<2x8xf32>
    %87 = vector.shape_cast %86 : vector<2x8xf32> to vector<2x8x1xf32>
    %88 = vector.broadcast %87 : vector<2x8x1xf32> to vector<2x8x8xf32>
    %89 = arith.divf %85, %88 : vector<2x8x8xf32>
    "tpu.trace_start"() <{level = 10 : i32, message = "bqk,bkd->bqd"}> : () -> ()
    %cst_36 = arith.constant dense<0.000000e+00> : vector<2x8x16xf32>
    %90 = tpu.matmul %89, %75, %cst_36 {dimension_numbers = #tpu.dot_dimension_numbers<[2], [1], [1], [2], [0, 0, 0, 1, 1, 2], [0], [0]>} : vector<2x8x8xf32>, vector<2x8x16xf32>, vector<2x8x16xf32> -> vector<2x8x16xf32>
    "tpu.trace_stop"() : () -> ()
    %91 = vector.shape_cast %90 : vector<2x8x16xf32> to vector<16x16xf32>
    %92 = vector.extract_strided_slice %28 {offsets = [16, 0], sizes = [16, 32], strides = [1, 1]} : vector<32x32xf32> to vector<16x32xf32>
    %cst_37 = arith.constant dense<0.000000e+00> : vector<16x32xf32>
    %93 = tpu.matmul %91, %92, %cst_37 {dimension_numbers = #tpu.dot_dimension_numbers<[1], [0], [0], [1], [0, 0, 1, 1], [], []>} : vector<16x16xf32>, vector<16x32xf32>, vector<16x32xf32> -> vector<16x32xf32>
    %94 = arith.addf %69, %93 : vector<16x32xf32>
    %95 = vector.broadcast %36 : vector<1x32xf32> to vector<16x32xf32>
    %96 = arith.addf %94, %95 : vector<16x32xf32>
    %97 = arith.addf %96, %23 : vector<16x32xf32>
    %cst_38 = arith.constant dense<0.000000e+00> : vector<16xf32>
    %98 = vector.multi_reduction <add>, %97, %cst_38 [1] : vector<16x32xf32> to vector<16xf32>
    %99 = vector.shape_cast %98 : vector<16xf32> to vector<16x1xf32>
    %cst_39 = arith.constant 3.200000e+01 : f32
    %100 = vector.broadcast %cst_39 : f32 to vector<16x1xf32>
    %101 = arith.divf %99, %100 : vector<16x1xf32>
    %102 = vector.broadcast %101 : vector<16x1xf32> to vector<16x32xf32>
    %103 = arith.subf %97, %102 : vector<16x32xf32>
    %104 = arith.mulf %103, %103 : vector<16x32xf32>
    %cst_40 = arith.constant dense<0.000000e+00> : vector<16xf32>
    %105 = vector.multi_reduction <add>, %104, %cst_40 [1] : vector<16x32xf32> to vector<16xf32>
    %106 = vector.shape_cast %105 : vector<16xf32> to vector<16x1xf32>
    %cst_41 = arith.constant 3.200000e+01 : f32
    %107 = vector.broadcast %cst_41 : f32 to vector<16x1xf32>
    %108 = arith.divf %106, %107 : vector<16x1xf32>
    %cst_42 = arith.constant 9.99999996E-13 : f32
    %109 = vector.broadcast %cst_42 : f32 to vector<16x1xf32>
    %110 = arith.addf %108, %109 : vector<16x1xf32>
    %111 = math.rsqrt %110 : vector<16x1xf32>
    %112 = vector.broadcast %111 : vector<16x1xf32> to vector<16x32xf32>
    %113 = arith.mulf %103, %112 : vector<16x32xf32>
    %114 = vector.broadcast %37 : vector<1x32xf32> to vector<16x32xf32>
    %115 = arith.mulf %113, %114 : vector<16x32xf32>
    %116 = vector.broadcast %38 : vector<1x32xf32> to vector<16x32xf32>
    %117 = arith.addf %115, %116 : vector<16x32xf32>
    %cst_43 = arith.constant dense<0.000000e+00> : vector<16x64xf32>
    %118 = tpu.matmul %117, %30, %cst_43 {dimension_numbers = #tpu.dot_dimension_numbers<[1], [0], [0], [1], [0, 0, 1, 1], [], []>} : vector<16x32xf32>, vector<32x64xf32>, vector<16x64xf32> -> vector<16x64xf32>
    %119 = vector.broadcast %39 : vector<1x64xf32> to vector<16x64xf32>
    %120 = arith.addf %118, %119 : vector<16x64xf32>
    %cst_44 = arith.constant 5.000000e-01 : f32
    %121 = vector.broadcast %cst_44 : f32 to vector<16x64xf32>
    %122 = arith.mulf %121, %120 : vector<16x64xf32>
    %cst_45 = arith.constant 4.471500e-02 : f32
    %123 = vector.broadcast %cst_45 : f32 to vector<16x64xf32>
    %124 = arith.mulf %123, %120 : vector<16x64xf32>
    %125 = arith.mulf %124, %120 : vector<16x64xf32>
    %126 = arith.mulf %125, %120 : vector<16x64xf32>
    %127 = arith.addf %120, %126 : vector<16x64xf32>
    %cst_46 = arith.constant 0.797884583 : f32
    %128 = vector.broadcast %cst_46 : f32 to vector<16x64xf32>
    %129 = arith.mulf %128, %127 : vector<16x64xf32>
    %130 = math.tanh %129 : vector<16x64xf32>
    %cst_47 = arith.constant 1.000000e+00 : f32
    %131 = vector.broadcast %cst_47 : f32 to vector<16x64xf32>
    %132 = arith.addf %131, %130 : vector<16x64xf32>
    %133 = arith.mulf %122, %132 : vector<16x64xf32>
    %cst_48 = arith.constant dense<0.000000e+00> : vector<16x32xf32>
    %134 = tpu.matmul %133, %32, %cst_48 {dimension_numbers = #tpu.dot_dimension_numbers<[1], [0], [0], [1], [0, 0, 1, 1], [], []>} : vector<16x64xf32>, vector<64x32xf32>, vector<16x32xf32> -> vector<16x32xf32>
    %135 = vector.broadcast %40 : vector<1x32xf32> to vector<16x32xf32>
    %136 = arith.addf %134, %135 : vector<16x32xf32>
    %137 = arith.addf %136, %117 : vector<16x32xf32>
    %cst_49 = arith.constant dense<0.000000e+00> : vector<16xf32>
    %138 = vector.multi_reduction <add>, %137, %cst_49 [1] : vector<16x32xf32> to vector<16xf32>
    %139 = vector.shape_cast %138 : vector<16xf32> to vector<16x1xf32>
    %cst_50 = arith.constant 3.200000e+01 : f32
    %140 = vector.broadcast %cst_50 : f32 to vector<16x1xf32>
    %141 = arith.divf %139, %140 : vector<16x1xf32>
    %142 = vector.broadcast %141 : vector<16x1xf32> to vector<16x32xf32>
    %143 = arith.subf %137, %142 : vector<16x32xf32>
    %144 = arith.mulf %143, %143 : vector<16x32xf32>
    %cst_51 = arith.constant dense<0.000000e+00> : vector<16xf32>
    %145 = vector.multi_reduction <add>, %144, %cst_51 [1] : vector<16x32xf32> to vector<16xf32>
    %146 = vector.shape_cast %145 : vector<16xf32> to vector<16x1xf32>
    %cst_52 = arith.constant 3.200000e+01 : f32
    %147 = vector.broadcast %cst_52 : f32 to vector<16x1xf32>
    %148 = arith.divf %146, %147 : vector<16x1xf32>
    %cst_53 = arith.constant 9.99999996E-13 : f32
    %149 = vector.broadcast %cst_53 : f32 to vector<16x1xf32>
    %150 = arith.addf %148, %149 : vector<16x1xf32>
    %151 = math.rsqrt %150 : vector<16x1xf32>
    %152 = vector.broadcast %151 : vector<16x1xf32> to vector<16x32xf32>
    %153 = arith.mulf %143, %152 : vector<16x32xf32>
    %154 = vector.broadcast %41 : vector<1x32xf32> to vector<16x32xf32>
    %155 = arith.mulf %153, %154 : vector<16x32xf32>
    %156 = vector.broadcast %42 : vector<1x32xf32> to vector<16x32xf32>
    %157 = arith.addf %155, %156 : vector<16x32xf32>
    %c1 = arith.constant 1 : index
    %c0_54 = arith.constant 0 : index
    %c0_55 = arith.constant 0 : index
    %158 = vector.load %arg3[%c1, %c0_54, %c0_55] : memref<2x32x96xf32, #tpu.memory_space<vmem>>, vector<1x32x96xf32>
    %159 = vector.shape_cast %158 : vector<1x32x96xf32> to vector<32x96xf32>
    %c1_56 = arith.constant 1 : index
    %c0_57 = arith.constant 0 : index
    %c0_58 = arith.constant 0 : index
    %160 = vector.load %arg4[%c1_56, %c0_57, %c0_58] : memref<2x32x32xf32, #tpu.memory_space<vmem>>, vector<1x32x32xf32>
    %161 = vector.shape_cast %160 : vector<1x32x32xf32> to vector<32x32xf32>
    %c1_59 = arith.constant 1 : index
    %c0_60 = arith.constant 0 : index
    %c0_61 = arith.constant 0 : index
    %162 = vector.load %arg5[%c1_59, %c0_60, %c0_61] : memref<2x32x64xf32, #tpu.memory_space<vmem>>, vector<1x32x64xf32>
    %163 = vector.shape_cast %162 : vector<1x32x64xf32> to vector<32x64xf32>
    %c1_62 = arith.constant 1 : index
    %c0_63 = arith.constant 0 : index
    %c0_64 = arith.constant 0 : index
    %164 = vector.load %arg6[%c1_62, %c0_63, %c0_64] : memref<2x64x32xf32, #tpu.memory_space<vmem>>, vector<1x64x32xf32>
    %165 = vector.shape_cast %164 : vector<1x64x32xf32> to vector<64x32xf32>
    %c1_65 = arith.constant 1 : index
    %c0_66 = arith.constant 0 : index
    %c0_67 = arith.constant 0 : index
    %166 = vector.load %arg7[%c1_65, %c0_66, %c0_67] : memref<2x8x128xf32, #tpu.memory_space<vmem>>, vector<1x8x128xf32>
    %167 = vector.shape_cast %166 : vector<1x8x128xf32> to vector<8x128xf32>
    %168 = vector.extract_strided_slice %167 {offsets = [0, 0], sizes = [1, 96], strides = [1, 1]} : vector<8x128xf32> to vector<1x96xf32>
    %169 = vector.extract_strided_slice %167 {offsets = [1, 0], sizes = [1, 32], strides = [1, 1]} : vector<8x128xf32> to vector<1x32xf32>
    %170 = vector.extract_strided_slice %167 {offsets = [2, 0], sizes = [1, 32], strides = [1, 1]} : vector<8x128xf32> to vector<1x32xf32>
    %171 = vector.extract_strided_slice %167 {offsets = [3, 0], sizes = [1, 32], strides = [1, 1]} : vector<8x128xf32> to vector<1x32xf32>
    %172 = vector.extract_strided_slice %167 {offsets = [4, 0], sizes = [1, 64], strides = [1, 1]} : vector<8x128xf32> to vector<1x64xf32>
    %173 = vector.extract_strided_slice %167 {offsets = [5, 0], sizes = [1, 32], strides = [1, 1]} : vector<8x128xf32> to vector<1x32xf32>
    %174 = vector.extract_strided_slice %167 {offsets = [6, 0], sizes = [1, 32], strides = [1, 1]} : vector<8x128xf32> to vector<1x32xf32>
    %175 = vector.extract_strided_slice %167 {offsets = [7, 0], sizes = [1, 32], strides = [1, 1]} : vector<8x128xf32> to vector<1x32xf32>
    %cst_68 = arith.constant dense<0.000000e+00> : vector<16x96xf32>
    %176 = tpu.matmul %157, %159, %cst_68 {dimension_numbers = #tpu.dot_dimension_numbers<[1], [0], [0], [1], [0, 0, 1, 1], [], []>} : vector<16x32xf32>, vector<32x96xf32>, vector<16x96xf32> -> vector<16x96xf32>
    %177 = vector.broadcast %168 : vector<1x96xf32> to vector<16x96xf32>
    %178 = arith.addf %176, %177 : vector<16x96xf32>
    %179 = vector.extract_strided_slice %178 {offsets = [0, 0], sizes = [16, 16], strides = [1, 1]} : vector<16x96xf32> to vector<16x16xf32>
    %180 = vector.shape_cast %179 : vector<16x16xf32> to vector<2x8x16xf32>
    %181 = vector.extract_strided_slice %178 {offsets = [0, 32], sizes = [16, 16], strides = [1, 1]} : vector<16x96xf32> to vector<16x16xf32>
    %182 = vector.shape_cast %181 : vector<16x16xf32> to vector<2x8x16xf32>
    %183 = vector.extract_strided_slice %178 {offsets = [0, 64], sizes = [16, 16], strides = [1, 1]} : vector<16x96xf32> to vector<16x16xf32>
    %184 = vector.shape_cast %183 : vector<16x16xf32> to vector<2x8x16xf32>
    "tpu.trace_start"() <{level = 10 : i32, message = "bqd,bkd->bqk"}> : () -> ()
    %cst_69 = arith.constant dense<0.000000e+00> : vector<2x8x8xf32>
    %185 = tpu.matmul %180, %182, %cst_69 {dimension_numbers = #tpu.dot_dimension_numbers<[2], [2], [1], [1], [0, 0, 0, 1, 1, 1], [0], [0]>} : vector<2x8x16xf32>, vector<2x8x16xf32>, vector<2x8x8xf32> -> vector<2x8x8xf32>
    "tpu.trace_stop"() : () -> ()
    %cst_70 = arith.constant 2.500000e-01 : f32
    %186 = vector.broadcast %cst_70 : f32 to vector<2x8x8xf32>
    %187 = arith.mulf %185, %186 : vector<2x8x8xf32>
    %188 = vector.broadcast %24 : vector<2x1x8xf32> to vector<2x8x8xf32>
    %189 = arith.addf %187, %188 : vector<2x8x8xf32>
    %cst_71 = arith.constant dense<0xFF800000> : vector<2x8xf32>
    %190 = vector.multi_reduction <maximumf>, %189, %cst_71 [2] : vector<2x8x8xf32> to vector<2x8xf32>
    %191 = vector.shape_cast %190 : vector<2x8xf32> to vector<2x8x1xf32>
    %192 = vector.broadcast %191 : vector<2x8x1xf32> to vector<2x8x8xf32>
    %193 = arith.subf %189, %192 : vector<2x8x8xf32>
    %194 = math.exp %193 : vector<2x8x8xf32>
    %cst_72 = arith.constant dense<0.000000e+00> : vector<2x8xf32>
    %195 = vector.multi_reduction <add>, %194, %cst_72 [2] : vector<2x8x8xf32> to vector<2x8xf32>
    %196 = vector.shape_cast %195 : vector<2x8xf32> to vector<2x8x1xf32>
    %197 = vector.broadcast %196 : vector<2x8x1xf32> to vector<2x8x8xf32>
    %198 = arith.divf %194, %197 : vector<2x8x8xf32>
    "tpu.trace_start"() <{level = 10 : i32, message = "bqk,bkd->bqd"}> : () -> ()
    %cst_73 = arith.constant dense<0.000000e+00> : vector<2x8x16xf32>
    %199 = tpu.matmul %198, %184, %cst_73 {dimension_numbers = #tpu.dot_dimension_numbers<[2], [1], [1], [2], [0, 0, 0, 1, 1, 2], [0], [0]>} : vector<2x8x8xf32>, vector<2x8x16xf32>, vector<2x8x16xf32> -> vector<2x8x16xf32>
    "tpu.trace_stop"() : () -> ()
    %200 = vector.shape_cast %199 : vector<2x8x16xf32> to vector<16x16xf32>
    %201 = vector.extract_strided_slice %161 {offsets = [0, 0], sizes = [16, 32], strides = [1, 1]} : vector<32x32xf32> to vector<16x32xf32>
    %cst_74 = arith.constant dense<0.000000e+00> : vector<16x32xf32>
    %202 = tpu.matmul %200, %201, %cst_74 {dimension_numbers = #tpu.dot_dimension_numbers<[1], [0], [0], [1], [0, 0, 1, 1], [], []>} : vector<16x16xf32>, vector<16x32xf32>, vector<16x32xf32> -> vector<16x32xf32>
    %203 = vector.extract_strided_slice %178 {offsets = [0, 16], sizes = [16, 16], strides = [1, 1]} : vector<16x96xf32> to vector<16x16xf32>
    %204 = vector.shape_cast %203 : vector<16x16xf32> to vector<2x8x16xf32>
    %205 = vector.extract_strided_slice %178 {offsets = [0, 48], sizes = [16, 16], strides = [1, 1]} : vector<16x96xf32> to vector<16x16xf32>
    %206 = vector.shape_cast %205 : vector<16x16xf32> to vector<2x8x16xf32>
    %207 = vector.extract_strided_slice %178 {offsets = [0, 80], sizes = [16, 16], strides = [1, 1]} : vector<16x96xf32> to vector<16x16xf32>
    %208 = vector.shape_cast %207 : vector<16x16xf32> to vector<2x8x16xf32>
    "tpu.trace_start"() <{level = 10 : i32, message = "bqd,bkd->bqk"}> : () -> ()
    %cst_75 = arith.constant dense<0.000000e+00> : vector<2x8x8xf32>
    %209 = tpu.matmul %204, %206, %cst_75 {dimension_numbers = #tpu.dot_dimension_numbers<[2], [2], [1], [1], [0, 0, 0, 1, 1, 1], [0], [0]>} : vector<2x8x16xf32>, vector<2x8x16xf32>, vector<2x8x8xf32> -> vector<2x8x8xf32>
    "tpu.trace_stop"() : () -> ()
    %cst_76 = arith.constant 2.500000e-01 : f32
    %210 = vector.broadcast %cst_76 : f32 to vector<2x8x8xf32>
    %211 = arith.mulf %209, %210 : vector<2x8x8xf32>
    %212 = vector.broadcast %24 : vector<2x1x8xf32> to vector<2x8x8xf32>
    %213 = arith.addf %211, %212 : vector<2x8x8xf32>
    %cst_77 = arith.constant dense<0xFF800000> : vector<2x8xf32>
    %214 = vector.multi_reduction <maximumf>, %213, %cst_77 [2] : vector<2x8x8xf32> to vector<2x8xf32>
    %215 = vector.shape_cast %214 : vector<2x8xf32> to vector<2x8x1xf32>
    %216 = vector.broadcast %215 : vector<2x8x1xf32> to vector<2x8x8xf32>
    %217 = arith.subf %213, %216 : vector<2x8x8xf32>
    %218 = math.exp %217 : vector<2x8x8xf32>
    %cst_78 = arith.constant dense<0.000000e+00> : vector<2x8xf32>
    %219 = vector.multi_reduction <add>, %218, %cst_78 [2] : vector<2x8x8xf32> to vector<2x8xf32>
    %220 = vector.shape_cast %219 : vector<2x8xf32> to vector<2x8x1xf32>
    %221 = vector.broadcast %220 : vector<2x8x1xf32> to vector<2x8x8xf32>
    %222 = arith.divf %218, %221 : vector<2x8x8xf32>
    "tpu.trace_start"() <{level = 10 : i32, message = "bqk,bkd->bqd"}> : () -> ()
    %cst_79 = arith.constant dense<0.000000e+00> : vector<2x8x16xf32>
    %223 = tpu.matmul %222, %208, %cst_79 {dimension_numbers = #tpu.dot_dimension_numbers<[2], [1], [1], [2], [0, 0, 0, 1, 1, 2], [0], [0]>} : vector<2x8x8xf32>, vector<2x8x16xf32>, vector<2x8x16xf32> -> vector<2x8x16xf32>
    "tpu.trace_stop"() : () -> ()
    %224 = vector.shape_cast %223 : vector<2x8x16xf32> to vector<16x16xf32>
    %225 = vector.extract_strided_slice %161 {offsets = [16, 0], sizes = [16, 32], strides = [1, 1]} : vector<32x32xf32> to vector<16x32xf32>
    %cst_80 = arith.constant dense<0.000000e+00> : vector<16x32xf32>
    %226 = tpu.matmul %224, %225, %cst_80 {dimension_numbers = #tpu.dot_dimension_numbers<[1], [0], [0], [1], [0, 0, 1, 1], [], []>} : vector<16x16xf32>, vector<16x32xf32>, vector<16x32xf32> -> vector<16x32xf32>
    %227 = arith.addf %202, %226 : vector<16x32xf32>
    %228 = vector.broadcast %169 : vector<1x32xf32> to vector<16x32xf32>
    %229 = arith.addf %227, %228 : vector<16x32xf32>
    %230 = arith.addf %229, %157 : vector<16x32xf32>
    %cst_81 = arith.constant dense<0.000000e+00> : vector<16xf32>
    %231 = vector.multi_reduction <add>, %230, %cst_81 [1] : vector<16x32xf32> to vector<16xf32>
    %232 = vector.shape_cast %231 : vector<16xf32> to vector<16x1xf32>
    %cst_82 = arith.constant 3.200000e+01 : f32
    %233 = vector.broadcast %cst_82 : f32 to vector<16x1xf32>
    %234 = arith.divf %232, %233 : vector<16x1xf32>
    %235 = vector.broadcast %234 : vector<16x1xf32> to vector<16x32xf32>
    %236 = arith.subf %230, %235 : vector<16x32xf32>
    %237 = arith.mulf %236, %236 : vector<16x32xf32>
    %cst_83 = arith.constant dense<0.000000e+00> : vector<16xf32>
    %238 = vector.multi_reduction <add>, %237, %cst_83 [1] : vector<16x32xf32> to vector<16xf32>
    %239 = vector.shape_cast %238 : vector<16xf32> to vector<16x1xf32>
    %cst_84 = arith.constant 3.200000e+01 : f32
    %240 = vector.broadcast %cst_84 : f32 to vector<16x1xf32>
    %241 = arith.divf %239, %240 : vector<16x1xf32>
    %cst_85 = arith.constant 9.99999996E-13 : f32
    %242 = vector.broadcast %cst_85 : f32 to vector<16x1xf32>
    %243 = arith.addf %241, %242 : vector<16x1xf32>
    %244 = math.rsqrt %243 : vector<16x1xf32>
    %245 = vector.broadcast %244 : vector<16x1xf32> to vector<16x32xf32>
    %246 = arith.mulf %236, %245 : vector<16x32xf32>
    %247 = vector.broadcast %170 : vector<1x32xf32> to vector<16x32xf32>
    %248 = arith.mulf %246, %247 : vector<16x32xf32>
    %249 = vector.broadcast %171 : vector<1x32xf32> to vector<16x32xf32>
    %250 = arith.addf %248, %249 : vector<16x32xf32>
    %cst_86 = arith.constant dense<0.000000e+00> : vector<16x64xf32>
    %251 = tpu.matmul %250, %163, %cst_86 {dimension_numbers = #tpu.dot_dimension_numbers<[1], [0], [0], [1], [0, 0, 1, 1], [], []>} : vector<16x32xf32>, vector<32x64xf32>, vector<16x64xf32> -> vector<16x64xf32>
    %252 = vector.broadcast %172 : vector<1x64xf32> to vector<16x64xf32>
    %253 = arith.addf %251, %252 : vector<16x64xf32>
    %cst_87 = arith.constant 5.000000e-01 : f32
    %254 = vector.broadcast %cst_87 : f32 to vector<16x64xf32>
    %255 = arith.mulf %254, %253 : vector<16x64xf32>
    %cst_88 = arith.constant 4.471500e-02 : f32
    %256 = vector.broadcast %cst_88 : f32 to vector<16x64xf32>
    %257 = arith.mulf %256, %253 : vector<16x64xf32>
    %258 = arith.mulf %257, %253 : vector<16x64xf32>
    %259 = arith.mulf %258, %253 : vector<16x64xf32>
    %260 = arith.addf %253, %259 : vector<16x64xf32>
    %cst_89 = arith.constant 0.797884583 : f32
    %261 = vector.broadcast %cst_89 : f32 to vector<16x64xf32>
    %262 = arith.mulf %261, %260 : vector<16x64xf32>
    %263 = math.tanh %262 : vector<16x64xf32>
    %cst_90 = arith.constant 1.000000e+00 : f32
    %264 = vector.broadcast %cst_90 : f32 to vector<16x64xf32>
    %265 = arith.addf %264, %263 : vector<16x64xf32>
    %266 = arith.mulf %255, %265 : vector<16x64xf32>
    %cst_91 = arith.constant dense<0.000000e+00> : vector<16x32xf32>
    %267 = tpu.matmul %266, %165, %cst_91 {dimension_numbers = #tpu.dot_dimension_numbers<[1], [0], [0], [1], [0, 0, 1, 1], [], []>} : vector<16x64xf32>, vector<64x32xf32>, vector<16x32xf32> -> vector<16x32xf32>
    %268 = vector.broadcast %173 : vector<1x32xf32> to vector<16x32xf32>
    %269 = arith.addf %267, %268 : vector<16x32xf32>
    %270 = arith.addf %269, %250 : vector<16x32xf32>
    %cst_92 = arith.constant dense<0.000000e+00> : vector<16xf32>
    %271 = vector.multi_reduction <add>, %270, %cst_92 [1] : vector<16x32xf32> to vector<16xf32>
    %272 = vector.shape_cast %271 : vector<16xf32> to vector<16x1xf32>
    %cst_93 = arith.constant 3.200000e+01 : f32
    %273 = vector.broadcast %cst_93 : f32 to vector<16x1xf32>
    %274 = arith.divf %272, %273 : vector<16x1xf32>
    %275 = vector.broadcast %274 : vector<16x1xf32> to vector<16x32xf32>
    %276 = arith.subf %270, %275 : vector<16x32xf32>
    %277 = arith.mulf %276, %276 : vector<16x32xf32>
    %cst_94 = arith.constant dense<0.000000e+00> : vector<16xf32>
    %278 = vector.multi_reduction <add>, %277, %cst_94 [1] : vector<16x32xf32> to vector<16xf32>
    %279 = vector.shape_cast %278 : vector<16xf32> to vector<16x1xf32>
    %cst_95 = arith.constant 3.200000e+01 : f32
    %280 = vector.broadcast %cst_95 : f32 to vector<16x1xf32>
    %281 = arith.divf %279, %280 : vector<16x1xf32>
    %cst_96 = arith.constant 9.99999996E-13 : f32
    %282 = vector.broadcast %cst_96 : f32 to vector<16x1xf32>
    %283 = arith.addf %281, %282 : vector<16x1xf32>
    %284 = math.rsqrt %283 : vector<16x1xf32>
    %285 = vector.broadcast %284 : vector<16x1xf32> to vector<16x32xf32>
    %286 = arith.mulf %276, %285 : vector<16x32xf32>
    %287 = vector.broadcast %174 : vector<1x32xf32> to vector<16x32xf32>
    %288 = arith.mulf %286, %287 : vector<16x32xf32>
    %289 = vector.broadcast %175 : vector<1x32xf32> to vector<16x32xf32>
    %290 = arith.addf %288, %289 : vector<16x32xf32>
    %291 = tpu.iota {dimensions = array<i32: 0>} : vector<2x16xi32>
    %292 = tpu.iota {dimensions = array<i32: 1>} : vector<2x16xi32>
    %c8_i32 = arith.constant 8 : i32
    %293 = vector.broadcast %c8_i32 : i32 to vector<2x16xi32>
    %294 = arith.muli %291, %293 : vector<2x16xi32>
    %295 = arith.cmpi eq, %292, %294 : vector<2x16xi32>
    %296 = arith.extui %295 : vector<2x16xi1> to vector<2x16xi32>
    %297 = arith.sitofp %296 : vector<2x16xi32> to vector<2x16xf32>
    %cst_97 = arith.constant dense<0.000000e+00> : vector<2x32xf32>
    %298 = tpu.matmul %297, %290, %cst_97 {dimension_numbers = #tpu.dot_dimension_numbers<[1], [0], [0], [1], [0, 0, 1, 1], [], []>} : vector<2x16xf32>, vector<16x32xf32>, vector<2x32xf32> -> vector<2x32xf32>
    %c0_98 = arith.constant 0 : index
    %c0_99 = arith.constant 0 : index
    %299 = vector.load %arg9[%c0_98, %c0_99] : memref<32x32xf32, #tpu.memory_space<vmem>>, vector<32x32xf32>
    %cst_100 = arith.constant dense<0.000000e+00> : vector<2x32xf32>
    %300 = tpu.matmul %298, %299, %cst_100 {dimension_numbers = #tpu.dot_dimension_numbers<[1], [0], [0], [1], [0, 0, 1, 1], [], []>} : vector<2x32xf32>, vector<32x32xf32>, vector<2x32xf32> -> vector<2x32xf32>
    %301 = vector.extract_strided_slice %0 {offsets = [2, 0], sizes = [1, 32], strides = [1, 1]} : vector<4x128xf32> to vector<1x32xf32>
    %302 = vector.broadcast %301 : vector<1x32xf32> to vector<2x32xf32>
    %303 = arith.addf %300, %302 : vector<2x32xf32>
    %304 = math.tanh %303 : vector<2x32xf32>
    %c0_101 = arith.constant 0 : index
    %c0_102 = arith.constant 0 : index
    %305 = vector.load %arg10[%c0_101, %c0_102] : memref<32x3xf32, #tpu.memory_space<vmem>>, vector<32x3xf32>
    %cst_103 = arith.constant dense<0.000000e+00> : vector<2x3xf32>
    %306 = tpu.matmul %304, %305, %cst_103 {dimension_numbers = #tpu.dot_dimension_numbers<[1], [0], [0], [1], [0, 0, 1, 1], [], []>} : vector<2x32xf32>, vector<32x3xf32>, vector<2x3xf32> -> vector<2x3xf32>
    %307 = vector.extract_strided_slice %0 {offsets = [3, 0], sizes = [1, 3], strides = [1, 1]} : vector<4x128xf32> to vector<1x3xf32>
    %308 = vector.broadcast %307 : vector<1x3xf32> to vector<2x3xf32>
    %309 = arith.addf %306, %308 : vector<2x3xf32>
    %c0_104 = arith.constant 0 : index
    %c0_105 = arith.constant 0 : index
    %310 = vector.load %arg11[%c0_104, %c0_105] : memref<2x3xf32, #tpu.memory_space<vmem>>, vector<2x3xf32>
    tpu.vector_store %arg11[%c0_104, %c0_105], %309 {strides = array<i32>} : memref<2x3xf32, #tpu.memory_space<vmem>>, vector<2x3xf32>,
    return
  }
  func.func @transform_0(%arg0: i32) -> (i32, i32) {
    %c0_i32 = arith.constant 0 : i32
    %c0_i32_0 = arith.constant 0 : i32
    %c0_i32_1 = arith.constant 0 : i32
    return %c0_i32, %c0_i32_0 : i32, i32
  }
  func.func @transform_1(%arg0: i32) -> (i32, i32, i32) {
    %c0_i32 = arith.constant 0 : i32
    %c0_i32_0 = arith.constant 0 : i32
    %c0_i32_1 = arith.constant 0 : i32
    %c0_i32_2 = arith.constant 0 : i32
    return %c0_i32, %c0_i32_0, %c0_i32_1 : i32, i32, i32
  }
  func.func @transform_2(%arg0: i32) -> (i32, i32, i32) {
    %c0_i32 = arith.constant 0 : i32
    %c0_i32_0 = arith.constant 0 : i32
    %c0_i32_1 = arith.constant 0 : i32
    %c0_i32_2 = arith.constant 0 : i32
    return %c0_i32, %c0_i32_0, %c0_i32_1 : i32, i32, i32
  }
  func.func @transform_3(%arg0: i32) -> (i32, i32, i32) {
    %c0_i32 = arith.constant 0 : i32
    %c0_i32_0 = arith.constant 0 : i32
    %c0_i32_1 = arith.constant 0 : i32
    %c0_i32_2 = arith.constant 0 : i32
    return %c0_i32, %c0_i32_0, %c0_i32_1 : i32, i32, i32
  }
  func.func @transform_4(%arg0: i32) -> (i32, i32, i32) {
    %c0_i32 = arith.constant 0 : i32
    %c0_i32_0 = arith.constant 0 : i32
    %c0_i32_1 = arith.constant 0 : i32
    %c0_i32_2 = arith.constant 0 : i32
    return %c0_i32, %c0_i32_0, %c0_i32_1 : i32, i32, i32
  }
  func.func @transform_5(%arg0: i32) -> (i32, i32, i32) {
    %c0_i32 = arith.constant 0 : i32
    %c0_i32_0 = arith.constant 0 : i32
    %c0_i32_1 = arith.constant 0 : i32
    %c0_i32_2 = arith.constant 0 : i32
    return %c0_i32, %c0_i32_0, %c0_i32_1 : i32, i32, i32
  }
  func.func @transform_6(%arg0: i32) -> (i32, i32, i32) {
    %c0_i32 = arith.constant 0 : i32
    %c0_i32_0 = arith.constant 0 : i32
    %c0_i32_1 = arith.constant 0 : i32
    %c0_i32_2 = arith.constant 0 : i32
    return %c0_i32, %c0_i32_0, %c0_i32_1 : i32, i32, i32
  }
  func.func @transform_7(%arg0: i32) -> (i32, i32) {
    %c0_i32 = arith.constant 0 : i32
    %c0_i32_0 = arith.constant 0 : i32
    %c0_i32_1 = arith.constant 0 : i32
    return %c0_i32, %c0_i32_0 : i32, i32
  }
  func.func @transform_8(%arg0: i32) -> (i32, i32) {
    %c0_i32 = arith.constant 0 : i32
    %c0_i32_0 = arith.constant 0 : i32
    %c0_i32_1 = arith.constant 0 : i32
    return %c0_i32, %c0_i32_0 : i32, i32
  }
  func.func @transform_9(%arg0: i32) -> (i32, i32) {
    %c0_i32 = arith.constant 0 : i32
    %c0_i32_0 = arith.constant 0 : i32
    %c0_i32_1 = arith.constant 0 : i32
    return %c0_i32, %c0_i32_0 : i32, i32
  }
  func.func @transform_10(%arg0: i32) -> (i32, i32) {
    %c0_i32 = arith.constant 0 : i32
    %c0_i32_0 = arith.constant 0 : i32
    %c0_i32_1 = arith.constant 0 : i32
    return %c0_i32, %c0_i32_0 : i32, i32
  }
}

</mosaic_0001>

<bundles_post_ra>
// kernel: tpu_custom_call.1
= control target key start
LH: loop header
LB: loop body
LE: loop exit
PB: predicated region body
PF: predicated region fallthrough
CT: control target
= control target key end

     0   :  { %15 = vsyncpa [#allocation3], 0  ;;  %s3919_s0 = inlined_call_operand.hbm [shape: f32[16,32], index: 0, kind: input, shape index: {}]   ;;  %s3920_s1 = inlined_call_operand.hbm [shape: f32[2,1,8], index: 1, kind: input, shape index: {}]   ;;  %s3921_s2 = inlined_call_operand.vmem [shape: f32[2,32,96], index: 2, kind: input, shape index: {}]   ;;  %s3922_s3 = inlined_call_operand.vmem [shape: f32[2,32,32], index: 3, kind: input, shape index: {}]   ;;  %s3923_s4 = inlined_call_operand.vmem [shape: f32[2,32,64], index: 4, kind: input, shape index: {}]   ;;  %s3924_s5 = inlined_call_operand.vmem [shape: f32[2,64,32], index: 5, kind: input, shape index: {}]   ;;  %s3925_s6 = inlined_call_operand.hbm [shape: f32[2,8,128], index: 6, kind: input, shape index: {}]   ;;  %s3926_s7 = inlined_call_operand.vmem [shape: f32[4,128], index: 7, kind: input, shape index: {}]   ;;  %s3927_s8 = inlined_call_operand.vmem [shape: f32[32,32], index: 8, kind: input, shape index: {}]   ;;  %s3928_s9 = inlined_call_operand.vmem [shape: f32[32,3], index: 9, kind: input, shape index: {}]   ;;  %s3929_s10 = inlined_call_operand.hbm [shape: f32[2,3], index: 10, kind: output, shape index: {}]  }
   0x1   :  { %16 = vsyncpa [#allocation6], 0 }
   0x2   :  { %17 = vsyncpa [#allocation4], 0  ;;  %s3378_s13 = smov [#allocation5]  }
   0x3   :  { %s35_s14 = sshll.u32 %s3378_s13, 4  ;;  %s36_s14 = int_to_ptr.vmem [resolvable:$true] %s35_s14 }
   0x4   :  { %s3300_s15 = scalar_lea.vmem %s36_s14, 32  ;;  %p3305_p1 = scmp.lt.s32.totalorder %s36_s14, %s36_s14 }
   0x5   :  { %p3301_p0 = scmp.ne.s32.totalorder %s36_s14, %s3300_s15  ;;  %p3306_p2 = scmp.lt.s32.totalorder %s3300_s15, %s3300_s15 }
   0x7   :  { %p3307_p3 = por %p3306_p2, %p3305_p1 }
   0x9   :  { %p3308_p4 = pnand %p3307_p3, %p3301_p0 }
   0xb   :  { %3311 = shalt.err (!%p3308_p4)
}
   0xc   :  { %s3379_s16 = smov 16   ;;  %s3380_s17 = smov 1  }
   0xd   :  { %41 = dma.hbm_to_vmem [thread:$0]  %s3920_s1, 32, %s36_s14, [#allocation6], %s3379_s16, %s3379_s16, %s3380_s17  }
   0xe   :  { %s3381_s20 = smov [#allocation2]  }
   0xf   :  { %s23_s21 = sshll.u32 %s3381_s20, 4  ;;  %s24_s21 = int_to_ptr.vmem [resolvable:$true] %s23_s21 }
  0x10   :  { %s3320_s22 = scalar_lea.vmem %s24_s21, 256  ;;  %p3325_p6 = scmp.lt.s32.totalorder %s24_s21, %s24_s21 }
  0x11   :  { %p3321_p5 = scmp.ne.s32.totalorder %s24_s21, %s3320_s22  ;;  %p3326_p7 = scmp.lt.s32.totalorder %s3320_s22, %s3320_s22 }
  0x13   :  { %p3327_p8 = por %p3326_p7, %p3325_p6 }
  0x15   :  { %p3328_p9 = pnand %p3327_p8, %p3321_p5 }
  0x17   :  { %3331 = shalt.err (!%p3328_p9)
}
  0x18   :  { %s3382_s23 = smov 128   ;;  %s3383_s24 = smov 8  }
  0x19   :  { %29 = dma.hbm_to_vmem [thread:$0]  %s3919_s0, 256, %s24_s21, [#allocation3], %s3382_s23, %s3382_s23, %s3383_s24  }
  0x1a   :  { %s3384_s27 = smov [#allocation7]  }
  0x1b   :  { %s55_s28 = sshll.u32 %s3384_s27, 4  ;;  %s56_s28 = int_to_ptr.vmem [resolvable:$true] %s55_s28 }
  0x1c   :  { %s3340_s1 = scalar_lea.vmem %s56_s28, 256  ;;  %p3345_p11 = scmp.lt.s32.totalorder %s56_s28, %s56_s28 }
  0x1d   :  { %p3341_p10 = scmp.ne.s32.totalorder %s56_s28, %s3340_s1  ;;  %p3346_p12 = scmp.lt.s32.totalorder %s3340_s1, %s3340_s1 }
  0x1f   :  { %p3347_p13 = por %p3346_p12, %p3345_p11 }
  0x21   :  { %p3348_p0 = pnand %p3347_p13, %p3341_p10 }
  0x23   :  { %3351 = shalt.err (!%p3348_p0)
}
  0x24   :  { %61 = dma.hbm_to_vmem [thread:$0]  %s3925_s6, 256, %s56_s28, [#allocation6], %s3382_s23, %s3382_s23, %s3383_s24  }
  0x25   :  { %3372 = dma.done.wait [#allocation3], 256  }
  0x26   :  { %3373 = vsyncadd [#allocation3], 4294967040 }
  0x27   :  { %3374 = dma.done.wait [#allocation6], 288  }
  0x28   :  { %3375 = vsyncadd [#allocation6], 4294967008  ;;  %vm80_vm0 = vcmask 261120   ;;  %v78_v0 = vld [vmem:[#allocation2] sm:$0xff]  ;;  %v79_v1 = vld [vmem:[#allocation2 + $0x8] sm:$0xff]  ;;  %v108_v23 = vlaneseq  ;;  %v3385_v39 = vmov 0.0  }
  0x29   :  { %v81_v2 = vsel %vm80_vm0, %v78_v0, 0.0  ;;  %v84_v3 = vsel %vm80_vm0, %v79_v1, 0.0  ;;  %v125_v14 = vld [vmem:[%s3921_s2 + $0x18] sm:$0xff]  ;;  %v124_v15 = vld [vmem:[%s3921_s2 + $0x10] sm:$0xff]  ;;  %v123_v16 = vld [vmem:[%s3921_s2 + $0x8] sm:$0xff]  ;;  %3006 = vmatprep.subr.mxu1 %v3385_v39  ;;  %vm3386_vm1 = vmmov 0  }
  0x2a   :  { %82 = vadd.xlane.f32.xlu0 %v81_v2  ;;  %2995 = vmatprep.subr.mxu0 %v125_v14  ;;  %v122_v17 = vld [vmem:[%s3921_s2] sm:$0xff]  ;;  %v3474_v25 = vshrl.u32 %v108_v23, 7  ;;  %v3501_v40 = vld [vmem:[#allocation7] sm:$0xff]  ;;  %s3387_s19 = smov 96   ;;  %vm231_vm2 = vcmask 130048   ;;  %vm399_vm3 = vcmask 64512  }
  0x2b   :  { %2996 = vmatpush3.msra.mxu0 %v125_v14  ;;  %v77_v27 = vld [vmem:[%s3926_s7] sm:$0xf]  ;;  %3008 = vmatprep.mubr.msk.f32.mxu1 %vm3386_vm1, %v3385_v39  ;;  %v3525_v49 = vld [vmem:[#allocation5] ss:$0 sm:$0xff]  ;;  %v3528_v54 = vld [vmem:[#allocation5 + $0x1] ss:$0 sm:$0xff] }
  0x2c   :  { %2997 = vmatprep.subr.mxu0 %v124_v15  ;;  %v3477_v26 = vsub.s32 0, %v3474_v25  ;;  %v3483_v28 = vsub.s32 1, %v3474_v25  ;;  %s3388_s20 = smov 64   ;;  %s3389_s21 = smov 80   ;;  %vm1223_vm4 = vcmask 523264   ;;  %vm2802_vm6 = vcmask 17408  }
  0x2d   :  { %2998 = vmatpush3.msra.mxu0 %v124_v15  ;;  %s3390_s22 = smov 112   ;;  %s3391_s23 = smov 48  }
  0x2e   :  { %85 = vadd.xlane.f32.xlu0 %v84_v3  ;;  %2999 = vmatprep.subr.mxu0 %v123_v16  ;;  %v111_v29 = vrot.slane %v77_v27, %v3477_v26  ;;  %v117_v32 = vrot.slane %v77_v27, %v3483_v28  ;;  %v146_v41 = vrot.slane %v3501_v40, %v3477_v26 }
  0x2f   :  { %3000 = vmatpush3.msra.mxu0 %v123_v16 }
  0x30   :  { %3001 = vmatprep.subr.mxu0 %v122_v17 }
  0x31   :  { %3002 = vmatpush3.msra.mxu0 %v122_v17 }
  0x32   :  { %3016 = vmatprep.subr.mxu0 %v3385_v39 }
  0xb3   :  { %v83_v4 = vpop.xlane.xlu0 %82 }
  0xb4   :  { %v88_v5 = vmul.f32 0.03125, %v83_v4 }
  0xb6   :  { %v90_v6 = vsub.f32 %v78_v0, %v88_v5 }
  0xb7   :  { %v86_v7 = vpop.xlane.xlu0 %85 }
  0xb8   :  { %v89_v8 = vmul.f32 0.03125, %v86_v7  ;;  %v92_v9 = vmul.f32 %v90_v6, %v90_v6 }
  0xba   :  { %v91_v10 = vsub.f32 %v79_v1, %v89_v8  ;;  %v94_v11 = vsel %vm80_vm0, %v92_v9, 0.0 }
  0xbb   :  { %95 = vadd.xlane.f32.xlu1 %v94_v11 }
  0xbc   :  { %v93_v12 = vmul.f32 %v91_v10, %v91_v10 }
  0xbe   :  { %v97_v13 = vsel %vm80_vm0, %v93_v12, 0.0 }
  0xbf   :  { %98 = vadd.xlane.f32.xlu1 %v97_v13 }
 0x144   :  { %v96_v18 = vpop.xlane.xlu1 %95 }
 0x145   :  { %v100_v19 = vmul.f32 0.03125, %v96_v18 }
 0x147   :  { %v102_v20 = vadd.f32 1e-12, %v100_v19 }
 0x148   :  { %v99_v21 = vpop.xlane.xlu1 %98 }
 0x149   :  { %3229 = vrsqrt.f32 %v102_v20  ;;  %v101_v22 = vmul.f32 0.03125, %v99_v21 }
 0x14b   :  { %v103_v24 = vadd.f32 1e-12, %v101_v22 }
 0x14d   :  { %3231 = vrsqrt.f32 %v103_v24 }
 0x156   :  { %v3230_v30 = vpop.eup %3229 }
 0x157   :  { %v106_v31 = vmul.f32 %v3230_v30, %v90_v6 }
 0x159   :  { %v112_v33 = vmul.f32 %v111_v29, %v106_v31 }
 0x15a   :  { %v3232_v34 = vpop.eup %3231 }
 0x15b   :  { %v107_v35 = vmul.f32 %v3232_v34, %v91_v10  ;;  %v3487_v36 = vadd.f32 %v117_v32, %v112_v33 }
 0x15d   :  { %v113_v37 = vmul.f32 %v111_v29, %v107_v35  ;;  %3003 = vmatprep.mubr.msk.f32.mxu0 %vm80_vm0, %v3487_v36 }
 0x15f   :  { %v3491_v38 = vadd.f32 %v117_v32, %v113_v37 }
 0x161   :  { %3004 = vmatmul.mubr.msk.f32.vlgmr.msra.gmra.mxu0 %vm80_vm0, %v3491_v38 }
 0x162   :  { %3018 = vmatprep.mubr.msk.f32.mxu0 %vm3386_vm1, %v3385_v39 }
 0x221   :  { %v3005_v42 = vpop.f32.mrf.mxu0 }
 0x222   :  { %v3505_v43 = vadd.f32 %v3005_v42, %v146_v41 }
 0x223   :  { %v219_v44 = vpop.f32.mrf.mxu0 }
 0x224   :  { %v3507_v45 = vadd.f32 %v219_v44, %v146_v41  ;;  %307 = vrot.lane.b32.xlu1 %v3505_v43, %s3387_s19 }
 0x226   :  { %229 = vrot.lane.b32.xlu0 %v3507_v45, %s3387_s19 }
 0x296   :  { %v308_v47 = vpop.permute.xlu1 %307 }
 0x298   :  { %v230_v46 = vpop.permute.xlu0 %229 }
 0x299   :  { %3007 = vmatpush3.xpose.msk.msra.mxu1 %vm231_vm2, %v230_v46 }
 0x29a   :  { %3011 = vmatprep.subr.mxu1 %v3385_v39 }
 0x29c   :  { %3009 = vmatmul.mubr.msk.f32.vlgmr.msra.gmra.mxu1 %vm231_vm2, %v3507_v45 }
 0x29d   :  { %3012 = vmatpush3.xpose.msk.msra.mxu1 %vm231_vm2, %v308_v47  ;;  %3013 = vmatprep.mubr.msk.f32.mxu1 %vm3386_vm1, %v3385_v39 }
 0x29e   :  { %3021 = vmatprep.subr.mxu1 %v3385_v39 }
 0x2a0   :  { %3014 = vmatmul.mubr.msk.f32.vlgmr.msra.gmra.mxu1 %vm231_vm2, %v3505_v43 }
 0x2a1   :  { %3023 = vmatprep.mubr.msk.f32.mxu1 %vm3386_vm1, %v3385_v39 }
 0x35c   :  { %v302_v48 = vpop.f32.mrf.mxu1 }
 0x35d   :  { %v383_v50 = vmul.f32 0.25, %v302_v48 }
 0x35e   :  { %v3010_v51 = vpop.f32.mrf.mxu1 }
 0x35f   :  { %v397_v52 = vadd.f32 %v3525_v49, %v383_v50 }
 0x360   :  { %v379_v53 = vpop.f32.mrf.mxu1 }
 0x361   :  { %v384_v55 = vmul.f32 0.25, %v379_v53  ;;  %v400_v56 = vsel %vm399_vm3, %v397_v52, -inf }
 0x362   :  { %401 = vmax.xlane.f32.xlu1 %v400_v56  ;;  %v3015_v57 = vpop.f32.mrf.mxu1 }
 0x363   :  { %v398_v58 = vadd.f32 %v3528_v54, %v384_v55 }
 0x365   :  { %v403_v59 = vsel %vm399_vm3, %v398_v58, -inf }
 0x366   :  { %404 = vmax.xlane.f32.xlu0 %v403_v59 }
 0x373   :  { %498 = vrot.lane.b32.xlu1 %v3505_v43, %s3388_s20 }
 0x377   :  { %576 = vrot.lane.b32.xlu1 %v3507_v45, %s3389_s21 }
 0x37b   :  { %654 = vrot.lane.b32.xlu1 %v3505_v43, %s3389_s21 }
 0x3eb   :  { %v402_v60 = vpop.xlane.xlu1 %401 }
 0x3ec   :  { %v406_v61 = vsub.f32 %v397_v52, %v402_v60 }
 0x3ee   :  { %v408_v62 = vmul.f32 1.442695, %v406_v61 }
 0x3ef   :  { %v499_v63 = vpop.permute.xlu1 %498  ;;  %v405_v0 = vpop.xlane.xlu0 %404 }
 0x3f0   :  { %3233 = vpow2.f32 %v408_v62  ;;  %v407_v1 = vsub.f32 %v398_v58, %v405_v0  ;;  %3022 = vmatpush3.msra.mxu1 %v499_v63  ;;  %v129_v62 = vld [vmem:[%s3922_s3 + $0x18] sm:$0xff]  ;;  %v128_v63 = vld [vmem:[%s3922_s3 + $0x10] sm:$0xff] }
 0x3f1   :  { %3031 = vmatprep.subr.mxu1 %v3385_v39 }
 0x3f2   :  { %v410_v2 = vmul.f32 1.442695, %v407_v1 }
 0x3f3   :  { %v577_v7 = vpop.permute.xlu1 %576 }
 0x3f4   :  { %3235 = vpow2.f32 %v410_v2 }
 0x3f7   :  { %v655_v8 = vpop.permute.xlu1 %654 }
 0x3fd   :  { %v3234_v3 = vpop.eup %3233 }
 0x3fe   :  { %v412_v4 = vsel %vm399_vm3, %v3234_v3, 0.0 }
 0x3ff   :  { %413 = vadd.xlane.f32.xlu0 %v412_v4 }
 0x401   :  { %v3236_v5 = vpop.eup %3235 }
 0x402   :  { %v415_v6 = vsel %vm399_vm3, %v3236_v5, 0.0 }
 0x403   :  { %416 = vadd.xlane.f32.xlu1 %v415_v6 }
 0x414   :  { %652 = vrot.lane.b32.xlu1 %v3505_v43, %s3390_s22 }
 0x415   :  { %422 = vrot.lane.b32.xlu0 %v3507_v45, %s3388_s20 }
 0x419   :  { %574 = vrot.lane.b32.xlu0 %v3507_v45, %s3390_s22 }
 0x488   :  { %v414_v9 = vpop.xlane.xlu0 %413 }
 0x489   :  { %3237 = vrcp.f32 %v414_v9 }
 0x48c   :  { %v417_v10 = vpop.xlane.xlu1 %416  ;;  %v423_v11 = vpop.permute.xlu0 %422 }
 0x48d   :  { %3239 = vrcp.f32 %v417_v10  ;;  %3017 = vmatpush3.msra.mxu0 %v423_v11 }
 0x48e   :  { %3026 = vmatprep.subr.mxu0 %v3385_v39 }
 0x490   :  { %v575_v16 = vpop.permute.xlu0 %574  ;;  %v653_v17 = vpop.permute.xlu1 %652 }
 0x496   :  { %v3238_v12 = vpop.eup %3237 }
 0x497   :  { %v419_v13 = vmul.f32 %v3238_v12, %v3234_v3 }
 0x499   :  { %3019 = vmatmul.mubr.msk.f32.vlgmr.msra.gmra.mxu0 %vm399_vm3, %v419_v13 }
 0x49a   :  { %v3240_v14 = vpop.eup %3239  ;;  %3027 = vmatpush3.xpose.msk.msra.mxu0 %vm231_vm2, %v577_v7  ;;  %3028 = vmatprep.mubr.msk.f32.mxu0 %vm3386_vm1, %v3385_v39 }
 0x49b   :  { %v421_v15 = vmul.f32 %v3240_v14, %v3236_v5  ;;  %3036 = vmatprep.subr.mxu0 %v3385_v39  ;;  %v1073_v5 = vrot.slane %v3501_v40, %v3483_v28 }
 0x49d   :  { %3024 = vmatmul.mubr.msk.f32.vlgmr.msra.gmra.mxu1 %vm399_vm3, %v421_v15  ;;  %3029 = vmatmul.mubr.msk.f32.vlgmr.msra.gmra.mxu0 %vm231_vm2, %v575_v16 }
 0x49e   :  { %3032 = vmatpush3.xpose.msk.msra.mxu1 %vm231_vm2, %v655_v8  ;;  %3033 = vmatprep.mubr.msk.f32.mxu1 %vm3386_vm1, %v3385_v39 }
 0x49f   :  { %3041 = vmatprep.subr.mxu1 %v3385_v39  ;;  %3038 = vmatprep.mubr.msk.f32.mxu0 %vm3386_vm1, %v3385_v39 }
 0x4a1   :  { %3034 = vmatmul.mubr.msk.f32.vlgmr.msra.gmra.mxu1 %vm231_vm2, %v653_v17 }
 0x4a2   :  { %3043 = vmatprep.mubr.msk.f32.mxu1 %vm3386_vm1, %v3385_v39 }
 0x559   :  { %v494_v18 = vpop.f32.mrf.mxu0 }
 0x55b   :  { %v3020_v19 = vpop.f32.mrf.mxu0 }
 0x55d   :  { %v570_v20 = vpop.f32.mrf.mxu1  ;;  %v648_v21 = vpop.f32.mrf.mxu0 }
 0x55e   :  { %v730_v22 = vmul.f32 0.25, %v648_v21 }
 0x55f   :  { %v3025_v24 = vpop.f32.mrf.mxu1  ;;  %v3030_v27 = vpop.f32.mrf.mxu0 }
 0x560   :  { %v732_v29 = vadd.f32 %v3525_v49, %v730_v22 }
 0x561   :  { %v726_v30 = vpop.f32.mrf.mxu1 }
 0x562   :  { %v731_v31 = vmul.f32 0.25, %v726_v30  ;;  %v734_v32 = vsel %vm399_vm3, %v732_v29, -inf  ;;  %v132_v30 = vld [vmem:[%s3923_s4 + $0x10] sm:$0xff] }
 0x563   :  { %735 = vmax.xlane.f32.xlu0 %v734_v32  ;;  %v3035_v33 = vpop.f32.mrf.mxu1  ;;  %v130_v32 = vld [vmem:[%s3923_s4] sm:$0xff] }
 0x564   :  { %v733_v34 = vadd.f32 %v3528_v54, %v731_v31  ;;  %v131_v31 = vld [vmem:[%s3923_s4 + $0x8] sm:$0xff] }
 0x566   :  { %v737_v35 = vsel %vm399_vm3, %v733_v34, -inf }
 0x567   :  { %738 = vmax.xlane.f32.xlu1 %v737_v35 }
 0x578   :  { %832 = vrot.lane.b32.xlu1 %v3505_v43, %s3391_s23  ;;  %v127_v43 = vld [vmem:[%s3922_s3 + $0x8] sm:$0xff] }
 0x5ec   :  { %v736_v37 = vpop.xlane.xlu0 %735 }
 0x5ed   :  { %v740_v41 = vsub.f32 %v732_v29, %v736_v37 }
 0x5ef   :  { %v742_v42 = vmul.f32 1.442695, %v740_v41 }
 0x5f0   :  { %v739_v44 = vpop.xlane.xlu1 %738 }
 0x5f1   :  { %3241 = vpow2.f32 %v742_v42  ;;  %v741_v46 = vsub.f32 %v733_v34, %v739_v44  ;;  %v3614_v44 = vsub.s32 2, %v3474_v25 }
 0x5f3   :  { %v744_v47 = vmul.f32 1.442695, %v741_v46 }
 0x5f4   :  { %v833_v48 = vpop.permute.xlu1 %832 }
 0x5f5   :  { %3243 = vpow2.f32 %v744_v47  ;;  %3042 = vmatpush3.msra.mxu1 %v833_v48  ;;  %v1107_v47 = vrot.slane %v3501_v40, %v3614_v44  ;;  %v3619_v48 = vsub.s32 3, %v3474_v25 }
 0x5f6   :  { %3053 = vmatprep.subr.mxu1 %v127_v43 }
 0x5fe   :  { %v3242_v50 = vpop.eup %3241 }
 0x5ff   :  { %v746_v51 = vsel %vm399_vm3, %v3242_v50, 0.0 }
 0x600   :  { %747 = vadd.xlane.f32.xlu0 %v746_v51 }
 0x602   :  { %v3244_v52 = vpop.eup %3243 }
 0x603   :  { %v749_v53 = vsel %vm399_vm3, %v3244_v52, 0.0 }
 0x604   :  { %750 = vadd.xlane.f32.xlu0 %v749_v53 }
 0x61a   :  { %756 = vrot.lane.b32.xlu0 %v3507_v45, %s3391_s23  ;;  %v126_v45 = vld [vmem:[%s3922_s3] sm:$0xff] }
 0x689   :  { %v748_v55 = vpop.xlane.xlu0 %747 }
 0x68a   :  { %3245 = vrcp.f32 %v748_v55 }
 0x68d   :  { %v751_v56 = vpop.xlane.xlu0 %750 }
 0x68e   :  { %3247 = vrcp.f32 %v751_v56 }
 0x691   :  { %v757_v57 = vpop.permute.xlu0 %756 }
 0x692   :  { %3037 = vmatpush3.msra.mxu0 %v757_v57 }
 0x693   :  { %3046 = vmatprep.subr.mxu0 %v129_v62 }
 0x697   :  { %v3246_v58 = vpop.eup %3245 }
 0x698   :  { %v753_v59 = vmul.f32 %v3246_v58, %v3242_v50  ;;  %v141_v58 = vld [vmem:[%s3924_s5 + $0x38] sm:$0xff] }
 0x69a   :  { %3039 = vmatmul.mubr.msk.f32.vlgmr.msra.gmra.mxu0 %vm399_vm3, %v753_v59  ;;  %v140_v59 = vld [vmem:[%s3924_s5 + $0x30] sm:$0xff] }
 0x69b   :  { %v3248_v60 = vpop.eup %3247  ;;  %3047 = vmatpush3.msra.mxu0 %v129_v62  ;;  %v136_v62 = vld [vmem:[%s3924_s5 + $0x10] sm:$0xff] }
 0x69c   :  { %v755_v61 = vmul.f32 %v3248_v60, %v3244_v52  ;;  %3048 = vmatprep.subr.mxu0 %v128_v63  ;;  %v139_v60 = vld [vmem:[%s3924_s5 + $0x28] sm:$0xff] }
 0x69d   :  { %3049 = vmatpush3.msra.mxu0 %v128_v63  ;;  %v135_v63 = vld [vmem:[%s3924_s5 + $0x8] sm:$0xff] }
 0x69e   :  { %3044 = vmatmul.mubr.msk.f32.vlgmr.msra.gmra.mxu1 %vm399_vm3, %v755_v61  ;;  %v138_v61 = vld [vmem:[%s3924_s5 + $0x20] sm:$0xff] }
 0x69f   :  { %3054 = vmatpush3.msra.mxu1 %v127_v43  ;;  %3057 = vmatprep.mubr.msk.f32.mxu1 %vm231_vm2, %v494_v18  ;;  %v1113_v43 = vrot.slane %v3501_v40, %v3619_v48 }
 0x6a0   :  { %3055 = vmatprep.subr.mxu1 %v126_v45 }
 0x6a1   :  { %3056 = vmatpush3.msra.mxu1 %v126_v45  ;;  %v137_v45 = vld [vmem:[%s3924_s5 + $0x18] sm:$0xff] }
 0x6a2   :  { %3058 = vmatmul.mubr.msk.f32.vlgmr.msra.gmra.mxu1 %vm231_vm2, %v570_v20  ;;  %3071 = vmatprep.subr.mxu1 %v141_v58 }
 0x6a3   :  { %3072 = vmatpush3.msra.mxu1 %v141_v58  ;;  %v2845_v58 = vld [vmem:[%s3921_s2 + $0x28] sm:$0xff] }
 0x6a4   :  { %3073 = vmatprep.subr.mxu1 %v140_v59 }
 0x6a5   :  { %3074 = vmatpush3.msra.mxu1 %v140_v59  ;;  %v2844_v59 = vld [vmem:[%s3921_s2 + $0x20] sm:$0xff] }
 0x6a6   :  { %3075 = vmatprep.subr.mxu1 %v139_v60 }
 0x6a7   :  { %3076 = vmatpush3.msra.mxu1 %v139_v60 }
 0x6a8   :  { %3077 = vmatprep.subr.mxu1 %v138_v61 }
 0x6a9   :  { %3078 = vmatpush3.msra.mxu1 %v138_v61 }
 0x6aa   :  { %3079 = vmatprep.subr.mxu1 %v137_v45 }
 0x6ab   :  { %3080 = vmatpush3.msra.mxu1 %v137_v45 }
 0x6ac   :  { %3081 = vmatprep.subr.mxu1 %v136_v62 }
 0x6ad   :  { %3082 = vmatpush3.msra.mxu1 %v136_v62 }
 0x6ae   :  { %3083 = vmatprep.subr.mxu1 %v135_v63 }
 0x6af   :  { %3084 = vmatpush3.msra.mxu1 %v135_v63 }
 0x75a   :  { %v828_v0 = vpop.f32.mrf.mxu0 }
 0x75b   :  { %3050 = vmatprep.mubr.msk.f32.mxu0 %vm231_vm2, %v828_v0  ;;  %v134_v0 = vld [vmem:[%s3924_s5] sm:$0xff] }
 0x75c   :  { %v3040_v1 = vpop.f32.mrf.mxu0  ;;  %3085 = vmatprep.subr.mxu1 %v134_v0 }
 0x75d   :  { %3086 = vmatpush3.msra.mxu1 %v134_v0  ;;  %v1118_v1 = vsub.s32 4, %v3474_v25 }
 0x75e   :  { %v904_v2 = vpop.f32.mrf.mxu1  ;;  %3106 = vmatprep.subr.mxu1 %v3385_v39 }
 0x75f   :  { %3051 = vmatmul.mubr.msk.f32.vlgmr.msra.gmra.mxu0 %vm231_vm2, %v904_v2  ;;  %v1119_v2 = vrot.slane %v3501_v40, %v1118_v1 }
 0x760   :  { %v3045_v3 = vpop.f32.mrf.mxu1 }
 0x762   :  { %v3059_v4 = vpop.f32.mrf.mxu1 }
 0x764   :  { %v1061_v8 = vpop.f32.mrf.mxu1 }
 0x81f   :  { %v3052_v6 = vpop.f32.mrf.mxu0 }
 0x820   :  { %v1067_v7 = vadd.f32 %v3059_v4, %v3052_v6 }
 0x821   :  { %v980_v9 = vpop.f32.mrf.mxu0 }
 0x822   :  { %v1075_v10 = vadd.f32 %v1073_v5, %v1067_v7  ;;  %v1062_v11 = vadd.f32 %v1061_v8, %v980_v9 }
 0x824   :  { %v1074_v12 = vadd.f32 %v1073_v5, %v1062_v11  ;;  %v1077_v13 = vadd.f32 %v1075_v10, %v3491_v38 }
 0x826   :  { %v1081_v14 = vsel %vm80_vm0, %v1077_v13, 0.0  ;;  %v1076_v15 = vadd.f32 %v1074_v12, %v3487_v36  ;;  %v133_v36 = vld [vmem:[%s3923_s4 + $0x18] sm:$0xff] }
 0x827   :  { %1082 = vadd.xlane.f32.xlu0 %v1081_v14  ;;  %3060 = vmatprep.subr.mxu0 %v133_v36 }
 0x828   :  { %v1078_v16 = vsel %vm80_vm0, %v1076_v15, 0.0  ;;  %3061 = vmatpush3.msra.mxu0 %v133_v36 }
 0x829   :  { %1079 = vadd.xlane.f32.xlu1 %v1078_v16  ;;  %3062 = vmatprep.subr.mxu0 %v132_v30 }
 0x82a   :  { %3063 = vmatpush3.msra.mxu0 %v132_v30 }
 0x82b   :  { %3064 = vmatprep.subr.mxu0 %v131_v31 }
 0x82c   :  { %3065 = vmatpush3.msra.mxu0 %v131_v31 }
 0x82d   :  { %3066 = vmatprep.subr.mxu0 %v130_v32 }
 0x82e   :  { %3067 = vmatpush3.msra.mxu0 %v130_v32 }
 0x8b0   :  { %v1083_v17 = vpop.xlane.xlu0 %1082 }
 0x8b1   :  { %v1085_v18 = vmul.f32 0.03125, %v1083_v17 }
 0x8b2   :  { %v1080_v19 = vpop.xlane.xlu1 %1079 }
 0x8b3   :  { %v1087_v20 = vsub.f32 %v1077_v13, %v1085_v18  ;;  %v1084_v21 = vmul.f32 0.03125, %v1080_v19 }
 0x8b5   :  { %v1086_v22 = vsub.f32 %v1076_v15, %v1084_v21  ;;  %v1089_v24 = vmul.f32 %v1087_v20, %v1087_v20 }
 0x8b7   :  { %v1093_v27 = vsel %vm80_vm0, %v1089_v24, 0.0  ;;  %v1088_v29 = vmul.f32 %v1086_v22, %v1086_v22 }
 0x8b8   :  { %1094 = vadd.xlane.f32.xlu1 %v1093_v27 }
 0x8b9   :  { %v1090_v38 = vsel %vm80_vm0, %v1088_v29, 0.0  ;;  %v1221_v29 = vsub.s32 5, %v3474_v25 }
 0x8ba   :  { %1091 = vadd.xlane.f32.xlu0 %v1090_v38 }
 0x8bb   :  { %v1222_v38 = vrot.slane %v3501_v40, %v1221_v29 }
 0x941   :  { %v1095_v33 = vpop.xlane.xlu1 %1094 }
 0x942   :  { %v1097_v34 = vmul.f32 0.03125, %v1095_v33 }
 0x943   :  { %v1092_v35 = vpop.xlane.xlu0 %1091 }
 0x944   :  { %v1099_v37 = vadd.f32 1e-12, %v1097_v34  ;;  %v1096_v41 = vmul.f32 0.03125, %v1092_v35 }
 0x946   :  { %3249 = vrsqrt.f32 %v1099_v37  ;;  %v1098_v42 = vadd.f32 1e-12, %v1096_v41 }
 0x948   :  { %3251 = vrsqrt.f32 %v1098_v42 }
 0x953   :  { %v3250_v46 = vpop.eup %3249 }
 0x954   :  { %v1103_v50 = vmul.f32 %v3250_v46, %v1087_v20 }
 0x955   :  { %v3252_v51 = vpop.eup %3251 }
 0x956   :  { %v1102_v52 = vmul.f32 %v3252_v51, %v1086_v22  ;;  %v1109_v53 = vmul.f32 %v1107_v47, %v1103_v50 }
 0x958   :  { %v1108_v55 = vmul.f32 %v1107_v47, %v1102_v52  ;;  %v3625_v57 = vadd.f32 %v1113_v43, %v1109_v53 }
 0x95a   :  { %v3623_v56 = vadd.f32 %v1113_v43, %v1108_v55 }
 0x95c   :  { %3068 = vmatprep.mubr.msk.f32.mxu0 %vm80_vm0, %v3623_v56 }
 0x95d   :  { %3069 = vmatmul.mubr.msk.f32.vlgmr.msra.gmra.mxu0 %vm80_vm0, %v3625_v57 }
 0xa1d   :  { %v3070_v3 = vpop.f32.mrf.mxu0 }
 0xa1e   :  { %v1198_v4 = vadd.f32 %v3070_v3, %v1119_v2 }
 0xa1f   :  { %v1192_v5 = vpop.f32.mrf.mxu0 }
 0xa20   :  { %v1204_v6 = vmul.f32 0.044715, %v1198_v4  ;;  %v1193_v7 = vadd.f32 %v1192_v5, %v1119_v2  ;;  %v1202_v22 = vmul.f32 0.5, %v1198_v4  ;;  %v1335_v2 = vsub.s32 6, %v3474_v25 }
 0xa21   :  { %v1341_v5 = vsub.s32 7, %v3474_v25 }
 0xa22   :  { %v1206_v8 = vmul.f32 %v1204_v6, %v1198_v4  ;;  %v1203_v9 = vmul.f32 0.044715, %v1193_v7  ;;  %v1201_v20 = vmul.f32 0.5, %v1193_v7 }
 0xa24   :  { %v1208_v10 = vmul.f32 %v1206_v8, %v1198_v4  ;;  %v1205_v11 = vmul.f32 %v1203_v9, %v1193_v7 }
 0xa26   :  { %v1210_v12 = vadd.f32 %v1208_v10, %v1198_v4  ;;  %v1207_v13 = vmul.f32 %v1205_v11, %v1193_v7  ;;  %v1336_v4 = vrot.slane %v3501_v40, %v1335_v2  ;;  %v1342_v10 = vrot.slane %v3501_v40, %v1341_v5 }
 0xa28   :  { %v1212_v14 = vmul.f32 0.7978846, %v1210_v12  ;;  %v1209_v15 = vadd.f32 %v1207_v13, %v1193_v7 }
 0xa2a   :  { %3253 = vtanh.f32 %v1212_v14  ;;  %v1211_v16 = vmul.f32 0.7978846, %v1209_v15  ;;  %v3705_v14 = vld [vmem:[#allocation7 + $0x8] sm:$0xff] }
 0xa2b   :  { %v1374_v15 = vrot.slane %v3705_v14, %v3477_v26 }
 0xa2c   :  { %3255 = vtanh.f32 %v1211_v16 }
 0xa37   :  { %v3254_v17 = vpop.eup %3253 }
 0xa38   :  { %v1216_v19 = vadd.f32 1.0, %v3254_v17 }
 0xa39   :  { %v3256_v18 = vpop.eup %3255 }
 0xa3a   :  { %v1215_v21 = vadd.f32 1.0, %v3256_v18  ;;  %v1218_v27 = vmul.f32 %v1216_v19, %v1202_v22 }
 0xa3c   :  { %v1217_v24 = vmul.f32 %v1215_v21, %v1201_v20 }
 0xa3e   :  { %3087 = vmatprep.mubr.msk.f32.mxu1 %vm1223_vm4, %v1217_v24 }
 0xa3f   :  { %3088 = vmatmul.mubr.msk.f32.vlgmr.msra.gmra.mxu1 %vm1223_vm4, %v1218_v27 }
 0xa40   :  { %3108 = vmatprep.mubr.msk.f32.mxu1 %vm3386_vm1, %v3385_v39 }
 0xaff   :  { %v3089_v36 = vpop.f32.mrf.mxu1 }
 0xb00   :  { %v1302_v30 = vadd.f32 %v3089_v36, %v1222_v38 }
 0xb01   :  { %v1296_v31 = vpop.f32.mrf.mxu1 }
 0xb02   :  { %v1297_v32 = vadd.f32 %v1296_v31, %v1222_v38  ;;  %v1306_v33 = vadd.f32 %v1302_v30, %v3625_v57  ;;  %v2846_v57 = vld [vmem:[%s3921_s2 + $0x30] sm:$0xff] }
 0xb04   :  { %v1310_v34 = vsel %vm80_vm0, %v1306_v33, 0.0  ;;  %v1305_v35 = vadd.f32 %v1297_v32, %v3623_v56  ;;  %v2847_v56 = vld [vmem:[%s3921_s2 + $0x38] sm:$0xff] }
 0xb05   :  { %1311 = vadd.xlane.f32.xlu1 %v1310_v34  ;;  %3090 = vmatprep.subr.mxu0 %v2847_v56 }
 0xb06   :  { %v1307_v37 = vsel %vm80_vm0, %v1305_v35, 0.0  ;;  %3091 = vmatpush3.msra.mxu0 %v2847_v56 }
 0xb07   :  { %1308 = vadd.xlane.f32.xlu0 %v1307_v37  ;;  %3092 = vmatprep.subr.mxu0 %v2846_v57 }
 0xb08   :  { %3093 = vmatpush3.msra.mxu0 %v2846_v57 }
 0xb09   :  { %3094 = vmatprep.subr.mxu0 %v2845_v58 }
 0xb0a   :  { %3095 = vmatpush3.msra.mxu0 %v2845_v58 }
 0xb0b   :  { %3096 = vmatprep.subr.mxu0 %v2844_v59 }
 0xb0c   :  { %3097 = vmatpush3.msra.mxu0 %v2844_v59 }
 0xb0d   :  { %3101 = vmatprep.subr.mxu0 %v3385_v39 }
 0xb8e   :  { %v1312_v41 = vpop.xlane.xlu1 %1311 }
 0xb8f   :  { %v1314_v42 = vmul.f32 0.03125, %v1312_v41 }
 0xb90   :  { %v1309_v46 = vpop.xlane.xlu0 %1308 }
 0xb91   :  { %v1316_v47 = vsub.f32 %v1306_v33, %v1314_v42  ;;  %v1313_v50 = vmul.f32 0.03125, %v1309_v46 }
 0xb93   :  { %v1315_v51 = vsub.f32 %v1305_v35, %v1313_v50  ;;  %v1318_v52 = vmul.f32 %v1316_v47, %v1316_v47 }
 0xb95   :  { %v1322_v53 = vsel %vm80_vm0, %v1318_v52, 0.0  ;;  %v1317_v43 = vmul.f32 %v1315_v51, %v1315_v51 }
 0xb96   :  { %1323 = vadd.xlane.f32.xlu1 %v1322_v53 }
 0xb97   :  { %v1319_v55 = vsel %vm80_vm0, %v1317_v43, 0.0 }
 0xb98   :  { %1320 = vadd.xlane.f32.xlu0 %v1319_v55 }
 0xc1f   :  { %v1324_v60 = vpop.xlane.xlu1 %1323 }
 0xc20   :  { %v1326_v61 = vmul.f32 0.03125, %v1324_v60 }
 0xc21   :  { %v1321_v45 = vpop.xlane.xlu0 %1320 }
 0xc22   :  { %v1328_v62 = vadd.f32 1e-12, %v1326_v61  ;;  %v1325_v63 = vmul.f32 0.03125, %v1321_v45 }
 0xc24   :  { %3257 = vrsqrt.f32 %v1328_v62  ;;  %v1327_v0 = vadd.f32 1e-12, %v1325_v63 }
 0xc26   :  { %3259 = vrsqrt.f32 %v1327_v0 }
 0xc31   :  { %v3258_v3 = vpop.eup %3257 }
 0xc32   :  { %v1332_v6 = vmul.f32 %v3258_v3, %v1316_v47 }
 0xc33   :  { %v3260_v7 = vpop.eup %3259 }
 0xc34   :  { %v1331_v8 = vmul.f32 %v3260_v7, %v1315_v51  ;;  %v1338_v9 = vmul.f32 %v1336_v4, %v1332_v6 }
 0xc36   :  { %v1337_v11 = vmul.f32 %v1336_v4, %v1331_v8  ;;  %v3697_v13 = vadd.f32 %v1342_v10, %v1338_v9 }
 0xc38   :  { %v3695_v12 = vadd.f32 %v1342_v10, %v1337_v11 }
 0xc3a   :  { %3098 = vmatprep.mubr.msk.f32.mxu0 %vm80_vm0, %v3695_v12 }
 0xc3b   :  { %3099 = vmatmul.mubr.msk.f32.vlgmr.msra.gmra.mxu0 %vm80_vm0, %v3697_v13 }
 0xc3c   :  { %3103 = vmatprep.mubr.msk.f32.mxu0 %vm3386_vm1, %v3385_v39 }
 0xcfb   :  { %v3100_v40 = vpop.f32.mrf.mxu0 }
 0xcfc   :  { %v3709_v16 = vadd.f32 %v3100_v40, %v1374_v15 }
 0xcfd   :  { %v1447_v17 = vpop.f32.mrf.mxu0 }
 0xcfe   :  { %v3711_v18 = vadd.f32 %v1447_v17, %v1374_v15  ;;  %1534 = vrot.lane.b32.xlu1 %v3709_v16, %s3387_s19 }
 0xd00   :  { %1457 = vrot.lane.b32.xlu0 %v3711_v18, %s3387_s19 }
 0xd70   :  { %v1535_v19 = vpop.permute.xlu1 %1534 }
 0xd71   :  { %3107 = vmatpush3.xpose.msk.msra.mxu1 %vm231_vm2, %v1535_v19 }
 0xd72   :  { %v1458_v20 = vpop.permute.xlu0 %1457  ;;  %3116 = vmatprep.subr.mxu1 %v3385_v39 }
 0xd73   :  { %3102 = vmatpush3.xpose.msk.msra.mxu0 %vm231_vm2, %v1458_v20 }
 0xd74   :  { %3109 = vmatmul.mubr.msk.f32.vlgmr.msra.gmra.mxu1 %vm231_vm2, %v3709_v16  ;;  %3111 = vmatprep.subr.mxu0 %v3385_v39 }
 0xd75   :  { %3118 = vmatprep.mubr.msk.f32.mxu1 %vm3386_vm1, %v3385_v39 }
 0xd76   :  { %3104 = vmatmul.mubr.msk.f32.vlgmr.msra.gmra.mxu0 %vm231_vm2, %v3711_v18 }
 0xd77   :  { %3113 = vmatprep.mubr.msk.f32.mxu0 %vm3386_vm1, %v3385_v39 }
 0xe34   :  { %v1606_v26 = vpop.f32.mrf.mxu1 }
 0xe35   :  { %v1611_v21 = vmul.f32 0.25, %v1606_v26 }
 0xe36   :  { %v1529_v22 = vpop.f32.mrf.mxu0  ;;  %v3110_v24 = vpop.f32.mrf.mxu1 }
 0xe37   :  { %v1610_v27 = vmul.f32 0.25, %v1529_v22  ;;  %v1613_v38 = vadd.f32 %v3528_v54, %v1611_v21 }
 0xe38   :  { %v3105_v36 = vpop.f32.mrf.mxu0 }
 0xe39   :  { %v1617_v30 = vsel %vm399_vm3, %v1613_v38, -inf  ;;  %v1612_v31 = vadd.f32 %v3525_v49, %v1610_v27 }
 0xe3a   :  { %1618 = vmax.xlane.f32.xlu0 %v1617_v30 }
 0xe3b   :  { %v1614_v32 = vsel %vm399_vm3, %v1612_v31, -inf }
 0xe3c   :  { %1615 = vmax.xlane.f32.xlu1 %v1614_v32 }
 0xec3   :  { %v1619_v33 = vpop.xlane.xlu0 %1618 }
 0xec4   :  { %v1621_v34 = vsub.f32 %v1613_v38, %v1619_v33 }
 0xec5   :  { %v1616_v35 = vpop.xlane.xlu1 %1615 }
 0xec6   :  { %v1624_v37 = vmul.f32 1.442695, %v1621_v34  ;;  %v1620_v41 = vsub.f32 %v1612_v31, %v1616_v35 }
 0xec8   :  { %3261 = vpow2.f32 %v1624_v37  ;;  %v1622_v42 = vmul.f32 1.442695, %v1620_v41  ;;  %v2848_v37 = vld [vmem:[%s3922_s3 + $0x20] sm:$0xff] }
 0xeca   :  { %3263 = vpow2.f32 %v1622_v42  ;;  %v2851_v42 = vld [vmem:[%s3922_s3 + $0x38] sm:$0xff] }
 0xed5   :  { %v3262_v46 = vpop.eup %3261 }
 0xed6   :  { %v1629_v47 = vsel %vm399_vm3, %v3262_v46, 0.0 }
 0xed7   :  { %v3264_v50 = vpop.eup %3263  ;;  %1630 = vadd.xlane.f32.xlu1 %v1629_v47 }
 0xed8   :  { %v1626_v51 = vsel %vm399_vm3, %v3264_v50, 0.0 }
 0xed9   :  { %1627 = vadd.xlane.f32.xlu0 %v1626_v51 }
 0xee8   :  { %1712 = vrot.lane.b32.xlu1 %v3709_v16, %s3388_s20 }
 0xeec   :  { %1790 = vrot.lane.b32.xlu1 %v3711_v18, %s3389_s21 }
 0xeef   :  { %1636 = vrot.lane.b32.xlu0 %v3711_v18, %s3388_s20 }
 0xef0   :  { %1868 = vrot.lane.b32.xlu1 %v3709_v16, %s3389_s21 }
 0xef3   :  { %1788 = vrot.lane.b32.xlu0 %v3711_v18, %s3390_s22 }
 0xef4   :  { %1866 = vrot.lane.b32.xlu1 %v3709_v16, %s3390_s22 }
 0xf60   :  { %v1631_v52 = vpop.xlane.xlu1 %1630 }
 0xf61   :  { %3265 = vrcp.f32 %v1631_v52 }
 0xf62   :  { %v1628_v53 = vpop.xlane.xlu0 %1627 }
 0xf63   :  { %3267 = vrcp.f32 %v1628_v53 }
 0xf64   :  { %v1713_v43 = vpop.permute.xlu1 %1712 }
 0xf65   :  { %3117 = vmatpush3.msra.mxu1 %v1713_v43  ;;  %v2287_v43 = vrot.slane %v3705_v14, %v3483_v28 }
 0xf66   :  { %v1637_v55 = vpop.permute.xlu0 %1636  ;;  %3126 = vmatprep.subr.mxu1 %v3385_v39 }
 0xf67   :  { %3112 = vmatpush3.msra.mxu0 %v1637_v55 }
 0xf68   :  { %v1791_v56 = vpop.permute.xlu1 %1790  ;;  %3121 = vmatprep.subr.mxu0 %v3385_v39 }
 0xf6a   :  { %v1789_v62 = vpop.permute.xlu0 %1788 }
 0xf6c   :  { %v1869_v58 = vpop.permute.xlu1 %1868 }
 0xf6e   :  { %v3266_v57 = vpop.eup %3265 }
 0xf6f   :  { %v1635_v59 = vmul.f32 %v3266_v57, %v3262_v46  ;;  %v2850_v46 = vld [vmem:[%s3922_s3 + $0x30] sm:$0xff] }
 0xf70   :  { %v3268_v60 = vpop.eup %3267  ;;  %v1867_v45 = vpop.permute.xlu1 %1866 }
 0xf71   :  { %3119 = vmatmul.mubr.msk.f32.vlgmr.msra.gmra.mxu1 %vm399_vm3, %v1635_v59  ;;  %v1633_v61 = vmul.f32 %v3268_v60, %v3264_v50 }
 0xf72   :  { %3127 = vmatpush3.xpose.msk.msra.mxu1 %vm231_vm2, %v1869_v58  ;;  %3128 = vmatprep.mubr.msk.f32.mxu1 %vm3386_vm1, %v3385_v39 }
 0xf73   :  { %3114 = vmatmul.mubr.msk.f32.vlgmr.msra.gmra.mxu0 %vm399_vm3, %v1633_v61  ;;  %3136 = vmatprep.subr.mxu1 %v3385_v39 }
 0xf74   :  { %3122 = vmatpush3.xpose.msk.msra.mxu0 %vm231_vm2, %v1791_v56  ;;  %3123 = vmatprep.mubr.msk.f32.mxu0 %vm3386_vm1, %v3385_v39 }
 0xf75   :  { %3129 = vmatmul.mubr.msk.f32.vlgmr.msra.gmra.mxu1 %vm231_vm2, %v1867_v45  ;;  %3131 = vmatprep.subr.mxu0 %v3385_v39 }
 0xf76   :  { %3138 = vmatprep.mubr.msk.f32.mxu1 %vm3386_vm1, %v3385_v39 }
 0xf77   :  { %3124 = vmatmul.mubr.msk.f32.vlgmr.msra.gmra.mxu0 %vm231_vm2, %v1789_v62 }
 0xf78   :  { %3133 = vmatprep.mubr.msk.f32.mxu0 %vm3386_vm1, %v3385_v39 }
0x1031   :  { %v1784_v63 = vpop.f32.mrf.mxu1 }
0x1033   :  { %v1708_v0 = vpop.f32.mrf.mxu0  ;;  %v3120_v3 = vpop.f32.mrf.mxu1 }
0x1035   :  { %v3115_v4 = vpop.f32.mrf.mxu0  ;;  %v1940_v6 = vpop.f32.mrf.mxu1 }
0x1036   :  { %v1945_v7 = vmul.f32 0.25, %v1940_v6 }
0x1037   :  { %v1862_v8 = vpop.f32.mrf.mxu0  ;;  %v3130_v9 = vpop.f32.mrf.mxu1 }
0x1038   :  { %v1944_v10 = vmul.f32 0.25, %v1862_v8  ;;  %v1947_v11 = vadd.f32 %v3528_v54, %v1945_v7 }
0x1039   :  { %v3125_v15 = vpop.f32.mrf.mxu0 }
0x103a   :  { %v1951_v40 = vsel %vm399_vm3, %v1947_v11, -inf  ;;  %v1946_v17 = vadd.f32 %v3525_v49, %v1944_v10  ;;  %v2854_v15 = vld [vmem:[%s3923_s4 + $0x30] sm:$0xff] }
0x103b   :  { %1952 = vmax.xlane.f32.xlu1 %v1951_v40  ;;  %v2853_v40 = vld [vmem:[%s3923_s4 + $0x28] sm:$0xff] }
0x103c   :  { %v1948_v19 = vsel %vm399_vm3, %v1946_v17, -inf }
0x103d   :  { %1949 = vmax.xlane.f32.xlu0 %v1948_v19 }
0x104c   :  { %2046 = vrot.lane.b32.xlu1 %v3709_v16, %s3391_s23  ;;  %v2849_v16 = vld [vmem:[%s3922_s3 + $0x28] sm:$0xff] }
0x10c4   :  { %v1953_v20 = vpop.xlane.xlu1 %1952 }
0x10c5   :  { %v1955_v26 = vsub.f32 %v1947_v11, %v1953_v20 }
0x10c6   :  { %v1950_v21 = vpop.xlane.xlu0 %1949 }
0x10c7   :  { %v1958_v22 = vmul.f32 1.442695, %v1955_v26  ;;  %v1954_v24 = vsub.f32 %v1946_v17, %v1950_v21  ;;  %v2852_v17 = vld [vmem:[%s3923_s4 + $0x20] sm:$0xff] }
0x10c8   :  { %v2047_v27 = vpop.permute.xlu1 %2046 }
0x10c9   :  { %3269 = vpow2.f32 %v1958_v22  ;;  %v1956_v54 = vmul.f32 1.442695, %v1954_v24  ;;  %3137 = vmatpush3.msra.mxu1 %v2047_v27 }
0x10ca   :  { %3148 = vmatprep.subr.mxu1 %v2849_v16 }
0x10cb   :  { %3271 = vpow2.f32 %v1956_v54  ;;  %v2321_v54 = vrot.slane %v3705_v14, %v3614_v44 }
0x10d6   :  { %v3270_v38 = vpop.eup %3269 }
0x10d7   :  { %v1963_v49 = vsel %vm399_vm3, %v3270_v38, 0.0 }
0x10d8   :  { %v3272_v36 = vpop.eup %3271  ;;  %1964 = vadd.xlane.f32.xlu0 %v1963_v49 }
0x10d9   :  { %v1960_v30 = vsel %vm399_vm3, %v3272_v36, 0.0 }
0x10dc   :  { %1961 = vadd.xlane.f32.xlu0 %v1960_v30 }
0x10f2   :  { %1970 = vrot.lane.b32.xlu0 %v3711_v18, %s3391_s23 }
0x1161   :  { %v1965_v31 = vpop.xlane.xlu0 %1964 }
0x1162   :  { %3273 = vrcp.f32 %v1965_v31 }
0x1165   :  { %v1962_v32 = vpop.xlane.xlu0 %1961 }
0x1166   :  { %3275 = vrcp.f32 %v1962_v32 }
0x1169   :  { %v1971_v33 = vpop.permute.xlu0 %1970 }
0x116a   :  { %3132 = vmatpush3.msra.mxu0 %v1971_v33 }
0x116b   :  { %3141 = vmatprep.subr.mxu0 %v2851_v42 }
0x116f   :  { %v3274_v34 = vpop.eup %3273 }
0x1170   :  { %v1969_v35 = vmul.f32 %v3274_v34, %v3270_v38  ;;  %v2863_v34 = vld [vmem:[%s3924_s5 + $0x78] sm:$0xff] }
0x1172   :  { %3139 = vmatmul.mubr.msk.f32.vlgmr.msra.gmra.mxu1 %vm399_vm3, %v1969_v35  ;;  %v2862_v35 = vld [vmem:[%s3924_s5 + $0x70] sm:$0xff] }
0x1173   :  { %v3276_v18 = vpop.eup %3275  ;;  %3149 = vmatpush3.msra.mxu1 %v2849_v16  ;;  %3152 = vmatprep.mubr.msk.f32.mxu1 %vm231_vm2, %v1708_v0  ;;  %v2327_v16 = vrot.slane %v3705_v14, %v3619_v48 }
0x1174   :  { %3150 = vmatprep.subr.mxu1 %v2848_v37  ;;  %v1967_v41 = vmul.f32 %v3276_v18, %v3272_v36  ;;  %v2860_v18 = vld [vmem:[%s3924_s5 + $0x60] sm:$0xff] }
0x1175   :  { %3151 = vmatpush3.msra.mxu1 %v2848_v37  ;;  %v2861_v37 = vld [vmem:[%s3924_s5 + $0x68] sm:$0xff] }
0x1176   :  { %3134 = vmatmul.mubr.msk.f32.vlgmr.msra.gmra.mxu0 %vm399_vm3, %v1967_v41  ;;  %3153 = vmatmul.mubr.msk.f32.vlgmr.msra.gmra.mxu1 %vm231_vm2, %v1784_v63  ;;  %v2859_v41 = vld [vmem:[%s3924_s5 + $0x58] sm:$0xff] }
0x1177   :  { %3142 = vmatpush3.msra.mxu0 %v2851_v42  ;;  %3166 = vmatprep.subr.mxu1 %v2863_v34  ;;  %v2858_v42 = vld [vmem:[%s3924_s5 + $0x50] sm:$0xff] }
0x1178   :  { %3143 = vmatprep.subr.mxu0 %v2850_v46  ;;  %3167 = vmatpush3.msra.mxu1 %v2863_v34  ;;  %v2549_v34 = vrot.slane %v3705_v14, %v1335_v2 }
0x1179   :  { %3144 = vmatpush3.msra.mxu0 %v2850_v46  ;;  %3168 = vmatprep.subr.mxu1 %v2862_v35  ;;  %v2857_v46 = vld [vmem:[%s3924_s5 + $0x48] sm:$0xff] }
0x117a   :  { %3169 = vmatpush3.msra.mxu1 %v2862_v35 }
0x117b   :  { %3170 = vmatprep.subr.mxu1 %v2861_v37 }
0x117c   :  { %3171 = vmatpush3.msra.mxu1 %v2861_v37  ;;  %v2561_v37 = vand.u32 127, %v108_v23  ;;  %v2642_v23 = vld [vmem:[%s3927_s8 + $0x18] sm:$0xff] }
0x117d   :  { %3172 = vmatprep.subr.mxu1 %v2860_v18 }
0x117e   :  { %3173 = vmatpush3.msra.mxu1 %v2860_v18  ;;  %v2562_v18 = vmul.u32 8, %v3474_v25  ;;  %v2641_v25 = vld [vmem:[%s3927_s8 + $0x10] sm:$0xff] }
0x117f   :  { %3174 = vmatprep.subr.mxu1 %v2859_v41 }
0x1180   :  { %3175 = vmatpush3.msra.mxu1 %v2859_v41  ;;  %vm2563_vm5 = vcmp.eq.s32.totalorder %v2561_v37, %v2562_v18 }
0x1181   :  { %3176 = vmatprep.subr.mxu1 %v2858_v42  ;;  %v2886_v2 = vsel %vm2563_vm5, 1.0, %v3385_v39 }
0x1182   :  { %3177 = vmatpush3.msra.mxu1 %v2858_v42  ;;  %v2555_v42 = vrot.slane %v3705_v14, %v1341_v5  ;;  %v2640_v5 = vld [vmem:[%s3927_s8 + $0x8] sm:$0xff] }
0x1183   :  { %3178 = vmatprep.subr.mxu1 %v2857_v46 }
0x1184   :  { %3179 = vmatpush3.msra.mxu1 %v2857_v46 }
0x1232   :  { %v2118_v47 = vpop.f32.mrf.mxu1 }
0x1234   :  { %v3140_v50 = vpop.f32.mrf.mxu1 }
0x1235   :  { %v2333_v50 = vrot.slane %v3705_v14, %v1118_v1 }
0x1236   :  { %v2042_v51 = vpop.f32.mrf.mxu0  ;;  %v3154_v53 = vpop.f32.mrf.mxu1 }
0x1237   :  { %3145 = vmatprep.mubr.msk.f32.mxu0 %vm231_vm2, %v2042_v51 }
0x1238   :  { %v3135_v52 = vpop.f32.mrf.mxu0  ;;  %3146 = vmatmul.mubr.msk.f32.vlgmr.msra.gmra.mxu0 %vm231_vm2, %v2118_v47  ;;  %v2275_v57 = vpop.f32.mrf.mxu1  ;;  %v2856_v47 = vld [vmem:[%s3924_s5 + $0x40] sm:$0xff] }
0x1239   :  { %3180 = vmatprep.subr.mxu1 %v2856_v47 }
0x123a   :  { %3181 = vmatpush3.msra.mxu1 %v2856_v47 }
0x123b   :  { %3203 = vmatprep.subr.mxu1 %v3385_v39 }
0x12f8   :  { %v3147_v55 = vpop.f32.mrf.mxu0 }
0x12f9   :  { %v2281_v56 = vadd.f32 %v3154_v53, %v3147_v55 }
0x12fa   :  { %v2194_v58 = vpop.f32.mrf.mxu0 }
0x12fb   :  { %v2289_v59 = vadd.f32 %v2287_v43, %v2281_v56  ;;  %v2276_v60 = vadd.f32 %v2275_v57, %v2194_v58 }
0x12fd   :  { %v2288_v61 = vadd.f32 %v2287_v43, %v2276_v60  ;;  %v2291_v45 = vadd.f32 %v2289_v59, %v3697_v13 }
0x12ff   :  { %v2295_v62 = vsel %vm80_vm0, %v2291_v45, 0.0  ;;  %v2290_v63 = vadd.f32 %v2288_v61, %v3695_v12  ;;  %v2855_v12 = vld [vmem:[%s3923_s4 + $0x38] sm:$0xff] }
0x1300   :  { %2296 = vadd.xlane.f32.xlu0 %v2295_v62  ;;  %3155 = vmatprep.subr.mxu0 %v2855_v12 }
0x1301   :  { %v2292_v0 = vsel %vm80_vm0, %v2290_v63, 0.0  ;;  %3156 = vmatpush3.msra.mxu0 %v2855_v12 }
0x1302   :  { %2293 = vadd.xlane.f32.xlu1 %v2292_v0  ;;  %3157 = vmatprep.subr.mxu0 %v2854_v15 }
0x1303   :  { %3158 = vmatpush3.msra.mxu0 %v2854_v15 }
0x1304   :  { %3159 = vmatprep.subr.mxu0 %v2853_v40 }
0x1305   :  { %3160 = vmatpush3.msra.mxu0 %v2853_v40 }
0x1306   :  { %3161 = vmatprep.subr.mxu0 %v2852_v17 }
0x1307   :  { %3162 = vmatpush3.msra.mxu0 %v2852_v17 }
0x1308   :  { %3185 = vmatprep.subr.mxu0 %v3385_v39 }
0x1389   :  { %v2297_v3 = vpop.xlane.xlu0 %2296 }
0x138a   :  { %v2299_v4 = vmul.f32 0.03125, %v2297_v3 }
0x138b   :  { %v2294_v28 = vpop.xlane.xlu1 %2293 }
0x138c   :  { %v2301_v6 = vsub.f32 %v2291_v45, %v2299_v4  ;;  %v2298_v7 = vmul.f32 0.03125, %v2294_v28 }
0x138e   :  { %v2300_v8 = vsub.f32 %v2290_v63, %v2298_v7  ;;  %v2303_v9 = vmul.f32 %v2301_v6, %v2301_v6 }
0x1390   :  { %v2307_v10 = vsel %vm80_vm0, %v2303_v9, 0.0  ;;  %v2302_v11 = vmul.f32 %v2300_v8, %v2300_v8  ;;  %v2436_v9 = vrot.slane %v3705_v14, %v1221_v29  ;;  %v2639_v14 = vld [vmem:[%s3927_s8] sm:$0xff] }
0x1391   :  { %2308 = vadd.xlane.f32.xlu1 %v2307_v10 }
0x1392   :  { %v2304_v13 = vsel %vm80_vm0, %v2302_v11, 0.0 }
0x1393   :  { %2305 = vadd.xlane.f32.xlu0 %v2304_v13 }
0x141a   :  { %v2309_v19 = vpop.xlane.xlu1 %2308 }
0x141b   :  { %v2311_v20 = vmul.f32 0.03125, %v2309_v19 }
0x141c   :  { %v2306_v26 = vpop.xlane.xlu0 %2305 }
0x141d   :  { %v2313_v21 = vadd.f32 1e-12, %v2311_v20  ;;  %v2310_v22 = vmul.f32 0.03125, %v2306_v26 }
0x141f   :  { %3277 = vrsqrt.f32 %v2313_v21  ;;  %v2312_v24 = vadd.f32 1e-12, %v2310_v22 }
0x1421   :  { %3279 = vrsqrt.f32 %v2312_v24 }
0x142c   :  { %v3278_v27 = vpop.eup %3277 }
0x142d   :  { %v2317_v38 = vmul.f32 %v3278_v27, %v2301_v6 }
0x142e   :  { %v3280_v49 = vpop.eup %3279 }
0x142f   :  { %v2316_v36 = vmul.f32 %v3280_v49, %v2300_v8  ;;  %v2323_v30 = vmul.f32 %v2321_v54, %v2317_v38 }
0x1431   :  { %v2322_v31 = vmul.f32 %v2321_v54, %v2316_v36  ;;  %v2329_v33 = vadd.f32 %v2327_v16, %v2323_v30 }
0x1433   :  { %v3818_v32 = vadd.f32 %v2327_v16, %v2322_v31 }
0x1435   :  { %3163 = vmatprep.mubr.msk.f32.mxu0 %vm80_vm0, %v3818_v32 }
0x1436   :  { %3164 = vmatmul.mubr.msk.f32.vlgmr.msra.gmra.mxu0 %vm80_vm0, %v2329_v33 }
0x1437   :  { %3189 = vmatprep.mubr.msk.f32.mxu0 %vm3386_vm1, %v3385_v39 }
0x14f6   :  { %v3165_v51 = vpop.f32.mrf.mxu0 }
0x14f7   :  { %v2412_v52 = vadd.f32 %v3165_v51, %v2333_v50 }
0x14f8   :  { %v2406_v53 = vpop.f32.mrf.mxu0 }
0x14f9   :  { %v2418_v43 = vmul.f32 0.044715, %v2412_v52  ;;  %v2407_v55 = vadd.f32 %v2406_v53, %v2333_v50  ;;  %v2416_v6 = vmul.f32 0.5, %v2412_v52 }
0x14fb   :  { %v2420_v56 = vmul.f32 %v2418_v43, %v2412_v52  ;;  %v2417_v57 = vmul.f32 0.044715, %v2407_v55  ;;  %v2415_v1 = vmul.f32 0.5, %v2407_v55 }
0x14fd   :  { %v2422_v58 = vmul.f32 %v2420_v56, %v2412_v52  ;;  %v2419_v59 = vmul.f32 %v2417_v57, %v2407_v55  ;;  %v2724_v56 = vld [vmem:[%s3928_s9 + $0x18] sm:$0xff]  ;;  %v2723_v57 = vld [vmem:[%s3928_s9 + $0x10] sm:$0xff] }
0x14ff   :  { %v2424_v60 = vadd.f32 %v2422_v58, %v2412_v52  ;;  %v2421_v61 = vmul.f32 %v2419_v59, %v2407_v55  ;;  %v2722_v58 = vld [vmem:[%s3928_s9 + $0x8] sm:$0xff]  ;;  %v2721_v59 = vld [vmem:[%s3928_s9] sm:$0xff]  ;;  %s3392_s9 = smov [#allocation8]  }
0x1500   :  { %s2810_s24 = sshll.u32 %s3392_s9, 4  ;;  %s2811_s24 = int_to_ptr.vmem [resolvable:$true] %s2810_s24 }
0x1501   :  { %v2426_v45 = vmul.f32 0.7978846, %v2424_v60  ;;  %v2423_v62 = vadd.f32 %v2421_v61, %v2407_v55  ;;  %v3291_v60 = vld [vmem:[%s3926_s7] sm:$0xf]  ;;  %s3352_s7 = scalar_lea.vmem %s2811_s24, 32  ;;  %p3357_p2 = scmp.lt.s32.totalorder %s2811_s24, %s2811_s24 }
0x1502   :  { %v2646_v61 = vrot.slane %v3291_v60, %v3614_v44  ;;  %p3353_p1 = scmp.ne.s32.totalorder %s2811_s24, %s3352_s7  ;;  %p3358_p3 = scmp.lt.s32.totalorder %s3352_s7, %s3352_s7 }
0x1503   :  { %3281 = vtanh.f32 %v2426_v45  ;;  %v2425_v63 = vmul.f32 0.7978846, %v2423_v62 }
0x1504   :  { %p3359_p4 = por %p3358_p3, %p3357_p2 }
0x1505   :  { %3283 = vtanh.f32 %v2425_v63 }
0x1506   :  { %p3360_p5 = pnand %p3359_p4, %p3353_p1 }
0x1510   :  { %v3282_v0 = vpop.eup %3281 }
0x1511   :  { %v2430_v4 = vadd.f32 1.0, %v3282_v0 }
0x1512   :  { %v3284_v3 = vpop.eup %3283 }
0x1513   :  { %v2429_v28 = vadd.f32 1.0, %v3284_v3  ;;  %v2432_v8 = vmul.f32 %v2430_v4, %v2416_v6  ;;  %v2728_v3 = vrot.slane %v3291_v60, %v3619_v48 }
0x1515   :  { %v2431_v7 = vmul.f32 %v2429_v28, %v2415_v1 }
0x1517   :  { %3182 = vmatprep.mubr.msk.f32.mxu1 %vm1223_vm4, %v2431_v7 }
0x1518   :  { %3183 = vmatmul.mubr.msk.f32.vlgmr.msra.gmra.mxu1 %vm1223_vm4, %v2432_v8 }
0x1519   :  { %3211 = vmatprep.mubr.msk.f32.mxu1 %vm3386_vm1, %v3385_v39  ;;  %3204 = vmatpush3.msra.mxu1 %v2724_v56 }
0x151a   :  { %3205 = vmatprep.subr.mxu1 %v3385_v39 }
0x151b   :  { %3206 = vmatpush3.msra.mxu1 %v2723_v57 }
0x151c   :  { %3207 = vmatprep.subr.mxu1 %v3385_v39 }
0x151d   :  { %3208 = vmatpush3.msra.mxu1 %v2722_v58 }
0x151e   :  { %3209 = vmatprep.subr.mxu1 %v3385_v39 }
0x151f   :  { %3210 = vmatpush3.msra.mxu1 %v2721_v59 }
0x15d8   :  { %v3184_v10 = vpop.f32.mrf.mxu1 }
0x15d9   :  { %v2515_v11 = vadd.f32 %v3184_v10, %v2436_v9 }
0x15da   :  { %v2509_v13 = vpop.f32.mrf.mxu1 }
0x15db   :  { %v2510_v12 = vadd.f32 %v2509_v13, %v2436_v9  ;;  %v2519_v15 = vadd.f32 %v2515_v11, %v2329_v33 }
0x15dd   :  { %v2523_v40 = vsel %vm80_vm0, %v2519_v15, 0.0  ;;  %v2518_v17 = vadd.f32 %v2510_v12, %v3818_v32 }
0x15de   :  { %2524 = vadd.xlane.f32.xlu0 %v2523_v40 }
0x15df   :  { %v2520_v19 = vsel %vm80_vm0, %v2518_v17, 0.0 }
0x15e0   :  { %2521 = vadd.xlane.f32.xlu1 %v2520_v19 }
0x1667   :  { %v2525_v20 = vpop.xlane.xlu0 %2524 }
0x1668   :  { %v2527_v26 = vmul.f32 0.03125, %v2525_v20 }
0x1669   :  { %v2522_v21 = vpop.xlane.xlu1 %2521 }
0x166a   :  { %v2529_v22 = vsub.f32 %v2519_v15, %v2527_v26  ;;  %v2526_v24 = vmul.f32 0.03125, %v2522_v21 }
0x166c   :  { %v2528_v27 = vsub.f32 %v2518_v17, %v2526_v24  ;;  %v2531_v29 = vmul.f32 %v2529_v22, %v2529_v22 }
0x166e   :  { %v2535_v54 = vsel %vm80_vm0, %v2531_v29, 0.0  ;;  %v2530_v38 = vmul.f32 %v2528_v27, %v2528_v27 }
0x166f   :  { %2536 = vadd.xlane.f32.xlu0 %v2535_v54 }
0x1670   :  { %v2532_v49 = vsel %vm80_vm0, %v2530_v38, 0.0 }
0x1671   :  { %2533 = vadd.xlane.f32.xlu1 %v2532_v49 }
0x16f8   :  { %v2537_v36 = vpop.xlane.xlu0 %2536 }
0x16f9   :  { %v2539_v30 = vmul.f32 0.03125, %v2537_v36 }
0x16fa   :  { %v2534_v16 = vpop.xlane.xlu1 %2533 }
0x16fb   :  { %v2541_v31 = vadd.f32 1e-12, %v2539_v30  ;;  %v2538_v32 = vmul.f32 0.03125, %v2534_v16 }
0x16fd   :  { %3285 = vrsqrt.f32 %v2541_v31  ;;  %v2540_v33 = vadd.f32 1e-12, %v2538_v32 }
0x16ff   :  { %3287 = vrsqrt.f32 %v2540_v33 }
0x170a   :  { %v3286_v35 = vpop.eup %3285 }
0x170b   :  { %v2545_v41 = vmul.f32 %v3286_v35, %v2529_v22 }
0x170c   :  { %v3288_v46 = vpop.eup %3287 }
0x170d   :  { %v2551_v47 = vmul.f32 %v2549_v34, %v2545_v41  ;;  %v2544_v50 = vmul.f32 %v3288_v46, %v2528_v27 }
0x170f   :  { %v2557_v51 = vadd.f32 %v2555_v42, %v2551_v47  ;;  %v2550_v52 = vmul.f32 %v2549_v34, %v2544_v50 }
0x1711   :  { %3186 = vmatpush3.msra.mxu0 %v2557_v51  ;;  %v2556_v53 = vadd.f32 %v2555_v42, %v2550_v52 }
0x1712   :  { %3187 = vmatprep.subr.mxu0 %v3385_v39 }
0x1713   :  { %3188 = vmatpush3.msra.mxu0 %v2556_v53 }
0x1714   :  { %3190 = vmatmul.mubr.msk.f32.vlgmr.msra.gmra.mxu0 %vm231_vm2, %v2886_v2  ;;  %3192 = vmatprep.subr.mxu0 %v3385_v39 }
0x1715   :  { %3193 = vmatpush3.msra.mxu0 %v2642_v23  ;;  %3200 = vmatprep.mubr.msk.f32.mxu0 %vm3386_vm1, %v3385_v39 }
0x1716   :  { %3194 = vmatprep.subr.mxu0 %v3385_v39 }
0x1717   :  { %3195 = vmatpush3.msra.mxu0 %v2641_v25 }
0x1718   :  { %3196 = vmatprep.subr.mxu0 %v3385_v39 }
0x1719   :  { %3197 = vmatpush3.msra.mxu0 %v2640_v5 }
0x171a   :  { %3198 = vmatprep.subr.mxu0 %v3385_v39 }
0x171b   :  { %3199 = vmatpush3.msra.mxu0 %v2639_v14 }
0x17d4   :  { %v2635_v43 = vpop.f32.mrf.mxu0 }
0x17d5   :  { %3201 = vmatmul.mubr.msk.f32.vlgmr.msra.gmra.mxu0 %vm80_vm0, %v2635_v43 }
0x17d6   :  { %v3191_v55 = vpop.f32.mrf.mxu0 }
0x1895   :  { %v2716_v45 = vpop.f32.mrf.mxu0 }
0x1896   :  { %v2717_v62 = vadd.f32 %v2716_v45, %v2646_v61 }
0x1897   :  { %v3202_v63 = vpop.f32.mrf.mxu0 }
0x1898   :  { %3289 = vtanh.f32 %v2717_v62 }
0x18a5   :  { %v3290_v0 = vpop.eup %3289 }
0x18a6   :  { %3212 = vmatmul.mubr.msk.f32.vlgmr.msra.gmra.mxu1 %vm80_vm0, %v3290_v0 }
0x1966   :  { %v2798_v4 = vpop.f32.mrf.mxu1 }
0x1967   :  { %v2799_v39 = vadd.f32 %v2798_v4, %v2728_v3 }
0x1968   :  { %v3213_v1 = vpop.f32.mrf.mxu1 }
0x1969   :  { %2803 = vst.msk [vmem:[#allocation8] sm:$0x3] %vm2802_vm6, %v2799_v39 }
0x196a   :  { %3363 = shalt.err (!%p3360_p5)
}
0x196b   :  { %2813 = dma.vmem_to_hbm [thread:$0]  %s2811_s24, 32, %s3929_s10, [#allocation4]  }
0x196c   :  { %3376 = dma.done.wait [#allocation4], 32  }
0x196d   :  { %3377 = vsyncadd [#allocation4], 4294967264 }
0x196e   :  { %2817 = vsyncpa [#allocation3], 1 }
0x196f   :  { %2818 = vsyncpa [#allocation6], 1 }
0x1970   :  { %2819 = vsyncpa [#allocation4], 1 }

</bundles_post_ra>
